<compile_context>
chip_gen: v7x
topology: tpu7x:2x2x1
jax: 0.10.0
libtpu: 0.0.40
codegen_flags: <defaults>
</compile_context>

<pallas_src>
import jax
import jax.numpy as jnp
import numpy as np
from jax.experimental import pallas as pl
from jax.experimental.pallas import tpu as pltpu

EOS = 0
SOS = 1

INPUT_S = 16    # embedding vocab size
HIDDEN_S = 32   # LSTM hidden size
OUTPUT_S = 16   # decoder output vocab size


# ---------------------------------------------------------------------------
# Fused kernel: encoder recurrence -> decoder recurrence (+ projection).
# ---------------------------------------------------------------------------
def _seq2seq_kernel(enc_ids_ref, dec_ids_ref,            # SMEM (scalar prefetch)
                    emb_ref, h0c0_ref,
                    enc_wih_ref, enc_whh_ref, enc_b_ref,
                    dec_wih_ref, dec_whh_ref, dec_b_ref,
                    wout_ref, bout_ref,
                    out_ref, hc_ref):
    H = h0c0_ref.shape[-1]
    T_in = enc_ids_ref.shape[0]
    T_out = dec_ids_ref.shape[0]

    def cell(x, h, c, wih_ref, whh_ref, b_ref):
        # Split gate matmul (no concat on the critical path).
        gates = (jnp.dot(x, wih_ref[...], preferred_element_type=jnp.float32)
                 + jnp.dot(h, whh_ref[...], preferred_element_type=jnp.float32)
                 + b_ref[...])                                   # (1, 4H)
        sig = jax.nn.sigmoid(gates)   # one EUP sweep over the full gate vector
        tnh = jnp.tanh(gates)         # one EUP sweep
        i_g = sig[:, 0 * H:1 * H]
        f_g = sig[:, 1 * H:2 * H]
        g_g = tnh[:, 2 * H:3 * H]
        o_g = sig[:, 3 * H:4 * H]
        c_new = f_g * c + i_g * g_g
        h_new = o_g * jnp.tanh(c_new)
        return h_new, c_new

    # (h, c) carried in vregs across both phases; written back once at the end.
    h = h0c0_ref[0:1, :]
    c = h0c0_ref[1:2, :]

    # --- Encoder recurrence (fully unrolled; T_in is static & tiny) ---------
    for t in range(T_in):
        x = emb_ref[pl.ds(enc_ids_ref[t], 1), :]                 # (1, H) gather
        h, c = cell(x, h, c, enc_wih_ref, enc_whh_ref, enc_b_ref)

    # --- Decoder recurrence (teacher forcing; ids = [SOS, out[:-1]]) --------
    for t in range(T_out):
        x = emb_ref[pl.ds(dec_ids_ref[t], 1), :]                 # (1, H) gather
        h, c = cell(x, h, c, dec_wih_ref, dec_whh_ref, dec_b_ref)
        logits = jnp.dot(h, wout_ref[...],
                         preferred_element_type=jnp.float32) + bout_ref[...]
        shifted = logits - jnp.max(logits, axis=-1, keepdims=True)
        log_probs = shifted - jnp.log(jnp.sum(jnp.exp(shifted), axis=-1,
                                              keepdims=True))
        out_ref[t:t + 1, :] = log_probs                          # dense VMEM store

    hc_ref[0:1, :] = h
    hc_ref[1:2, :] = c


# ---------------------------------------------------------------------------
# Wrapper: one fused pallas_call for the whole forward.
# ---------------------------------------------------------------------------
def seq2seq_forward(enc_ids, dec_ids, emb_table, h0c0,
                    enc_wih_t, enc_whh_t, enc_b,
                    dec_wih_t, dec_whh_t, dec_b,
                    wout_t, bout):
    T_out = dec_ids.shape[0]
    V, H = emb_table.shape
    O = wout_t.shape[-1]

    def full(shape):
        # Full-array resident block (constant index map).
        return pl.BlockSpec(shape, lambda i, *_: (0,) * len(shape))

    out_shapes = (jax.ShapeDtypeStruct((T_out, O), jnp.float32),   # log-probs
                  jax.ShapeDtypeStruct((2, H), jnp.float32))       # final (h, c)

    return pl.pallas_call(
        _seq2seq_kernel,
        out_shape=out_shapes,
        grid_spec=pltpu.PrefetchScalarGridSpec(
            num_scalar_prefetch=2,           # enc_ids, dec_ids -> SMEM
            grid=(1,),                       # single step; recurrences unrolled in-kernel
            in_specs=[
                full((V, H)),                # embedding table (resident, 2 KiB)
                full((2, H)),                # initial (h0, c0)
                full((H, 4 * H)),            # encoder W_ih^T
                full((H, 4 * H)),            # encoder W_hh^T
                full((1, 4 * H)),            # encoder bias
                full((H, 4 * H)),            # decoder W_ih^T
                full((H, 4 * H)),            # decoder W_hh^T
                full((1, 4 * H)),            # decoder bias
                full((H, O)),                # W_out^T
                full((1, O)),                # output bias
            ],
            out_specs=(full((T_out, O)), full((2, H))),
        ),
        compiler_params=pltpu.CompilerParams(
            dimension_semantics=("arbitrary",)),
    )(enc_ids, dec_ids, emb_table, h0c0,
      enc_wih_t, enc_whh_t, enc_b,
      dec_wih_t, dec_whh_t, dec_b,
      wout_t, bout)


# ---------------------------------------------------------------------------
# Model wrapper.
# ---------------------------------------------------------------------------
class Seq2SeqPallas:
    """JAX/Pallas equivalent of the PyTorch `Seq2Seq` forward (train_mode=1)."""

    def __init__(self, input_s=INPUT_S, hidden_s=HIDDEN_S, output_s=OUTPUT_S,
                 key=jax.random.PRNGKey(0)):
        self.input_s, self.hidden_s, self.output_s = input_s, hidden_s, output_s
        keys = jax.random.split(key, 11)
        H = hidden_s
        bound = 1.0 / np.sqrt(H)

        # nn.Embedding(input_s, hidden_s): N(0, 1)
        self.embedding = jax.random.normal(keys[0], (input_s, H), jnp.float32)

        def lstm_params(k0, k1, k2, k3):
            w_ih = jax.random.uniform(k0, (4 * H, H), jnp.float32, -bound, bound)
            w_hh = jax.random.uniform(k1, (4 * H, H), jnp.float32, -bound, bound)
            b_ih = jax.random.uniform(k2, (4 * H,), jnp.float32, -bound, bound)
            b_hh = jax.random.uniform(k3, (4 * H,), jnp.float32, -bound, bound)
            # Kernel layout: W_ih^T (H, 4H), W_hh^T (H, 4H), combined bias (1, 4H)
            return w_ih.T, w_hh.T, (b_ih + b_hh).reshape(1, 4 * H)

        self.enc_wih_t, self.enc_whh_t, self.enc_b = lstm_params(*keys[1:5])
        self.dec_wih_t, self.dec_whh_t, self.dec_b = lstm_params(*keys[5:9])

        w_out = jax.random.uniform(keys[9], (output_s, H), jnp.float32,
                                   -bound, bound)
        b_out = jax.random.uniform(keys[10], (output_s,), jnp.float32,
                                   -bound, bound)
        self.w_out_t = w_out.T                     # (H, output_s)
        self.b_out = b_out.reshape(1, output_s)

    def __call__(self, input_seq, output_seq, hidden, train_mode=1):
        # TODO(synk): eval-mode branch (topk greedy decode with data-dependent
        # early EOS break) is not implemented; only train_mode == 1 is covered.
        assert train_mode == 1
        H = self.hidden_s
        h0, c0 = hidden
        h0c0 = jnp.concatenate([h0.reshape(1, H), c0.reshape(1, H)], axis=0)

        # Teacher forcing: step-0 input is embedding(SOS), then embedded_out[:-1].
        dec_ids = jnp.concatenate(
            [jnp.array([SOS], jnp.int32), output_seq[:-1].astype(jnp.int32)])

        dec_out, hc = seq2seq_forward(
            input_seq.astype(jnp.int32), dec_ids, self.embedding, h0c0,
            self.enc_wih_t, self.enc_whh_t, self.enc_b,
            self.dec_wih_t, self.dec_whh_t, self.dec_b,
            self.w_out_t, self.b_out)

        decoder_hidden = (hc[0:1].reshape(1, 1, H), hc[1:2].reshape(1, 1, H))
        return dec_out, decoder_hidden


# ---------------------------------------------------------------------------
# Pure-JAX reference (same math, plain loops).
# ---------------------------------------------------------------------------
def _lstm_cell_ref(x, h, c, wih_t, whh_t, b):
    H = h.shape[-1]
    gates = x @ wih_t + h @ whh_t + b
    i = jax.nn.sigmoid(gates[:, 0:H])
    f = jax.nn.sigmoid(gates[:, H:2 * H])
    g = jnp.tanh(gates[:, 2 * H:3 * H])
    o = jax.nn.sigmoid(gates[:, 3 * H:4 * H])
    c_new = f * c + i * g
    h_new = o * jnp.tanh(c_new)
    return h_new, c_new


def seq2seq_ref(model, input_seq, output_seq, hidden):
    H = model.hidden_s
    h, c = hidden[0].reshape(1, H), hidden[1].reshape(1, H)
    emb_in = model.embedding[input_seq]
    emb_out = model.embedding[output_seq]
    for t in range(input_seq.shape[0]):
        h, c = _lstm_cell_ref(emb_in[t:t + 1], h, c,
                              model.enc_wih_t, model.enc_whh_t, model.enc_b)
    dec_outs = []
    x = model.embedding[SOS:SOS + 1]
    for t in range(output_seq.shape[0]):
        h, c = _lstm_cell_ref(x, h, c,
                              model.dec_wih_t, model.dec_whh_t, model.dec_b)
        logits = h @ model.w_out_t + model.b_out
        dec_outs.append(jax.nn.log_softmax(logits, axis=-1)[0])
        x = emb_out[t:t + 1]
    return jnp.stack(dec_outs), (h.reshape(1, 1, H), c.reshape(1, 1, H))


if __name__ == "__main__":
    key = jax.random.PRNGKey(0)
    k_param, k_in, k_out, k_h, k_c = jax.random.split(key, 5)

    input_length, output_length = 6, 5
    model = Seq2SeqPallas(INPUT_S, HIDDEN_S, OUTPUT_S, key=k_param)

    input_seq = jax.random.randint(k_in, (input_length,), 2, INPUT_S, jnp.int32)
    output_seq = jax.random.randint(k_out, (output_length,), 2, INPUT_S, jnp.int32)
    h0 = jax.random.normal(k_h, (1, 1, HIDDEN_S), jnp.float32)
    c0 = jax.random.normal(k_c, (1, 1, HIDDEN_S), jnp.float32)

    dec_out, (h_n, c_n) = model(input_seq, output_seq, (h0, c0), train_mode=1)
    jax.block_until_ready((dec_out, h_n, c_n))

    ref_out, (h_ref, c_ref) = seq2seq_ref(model, input_seq, output_seq, (h0, c0))

    assert dec_out.shape == (output_length, OUTPUT_S)
    assert h_n.shape == (1, 1, HIDDEN_S) and c_n.shape == (1, 1, HIDDEN_S)
    np.testing.assert_allclose(np.asarray(dec_out), np.asarray(ref_out),
                               rtol=1e-4, atol=1e-4)
    np.testing.assert_allclose(np.asarray(h_n), np.asarray(h_ref),
                               rtol=1e-4, atol=1e-4)
    np.testing.assert_allclose(np.asarray(c_n), np.asarray(c_ref),
                               rtol=1e-4, atol=1e-4)

    print("KERNEL_OK")
</pallas_src>

<mosaic_0001>
module attributes {stable_mosaic.version = 11 : i64} {
  func.func @_seq2seq_kernel(%arg0: i32, %arg1: memref<6xi32, #tpu.memory_space<smem>>, %arg2: memref<5xi32, #tpu.memory_space<smem>>, %arg3: memref<16x32xf32, #tpu.memory_space<vmem>>, %arg4: memref<2x32xf32, #tpu.memory_space<vmem>>, %arg5: memref<32x128xf32, #tpu.memory_space<vmem>>, %arg6: memref<32x128xf32, #tpu.memory_space<vmem>>, %arg7: memref<1x128xf32, #tpu.memory_space<vmem>>, %arg8: memref<32x128xf32, #tpu.memory_space<vmem>>, %arg9: memref<32x128xf32, #tpu.memory_space<vmem>>, %arg10: memref<1x128xf32, #tpu.memory_space<vmem>>, %arg11: memref<32x16xf32, #tpu.memory_space<vmem>>, %arg12: memref<1x16xf32, #tpu.memory_space<vmem>>, %arg13: memref<5x16xf32, #tpu.memory_space<vmem>>, %arg14: memref<2x32xf32, #tpu.memory_space<vmem>>) attributes {dimension_semantics = [#tpu.dimension_semantics<arbitrary>], iteration_bounds = array<i64: 1>, scalar_prefetch = 2 : i64, scratch_operands = 0 : i64, tpu.core_type = #tpu.core_type<tc>, window_params = [{pipeline_mode = #tpu.pipeline_mode<synchronous>, transform_indices = @transform_0, window_bounds = array<i64: 16, 32>}, {pipeline_mode = #tpu.pipeline_mode<synchronous>, transform_indices = @transform_1, window_bounds = array<i64: 2, 32>}, {pipeline_mode = #tpu.pipeline_mode<synchronous>, transform_indices = @transform_2, window_bounds = array<i64: 32, 128>}, {pipeline_mode = #tpu.pipeline_mode<synchronous>, transform_indices = @transform_3, window_bounds = array<i64: 32, 128>}, {pipeline_mode = #tpu.pipeline_mode<synchronous>, transform_indices = @transform_4, window_bounds = array<i64: 1, 128>}, {pipeline_mode = #tpu.pipeline_mode<synchronous>, transform_indices = @transform_5, window_bounds = array<i64: 32, 128>}, {pipeline_mode = #tpu.pipeline_mode<synchronous>, transform_indices = @transform_6, window_bounds = array<i64: 32, 128>}, {pipeline_mode = #tpu.pipeline_mode<synchronous>, transform_indices = @transform_7, window_bounds = array<i64: 1, 128>}, {pipeline_mode = #tpu.pipeline_mode<synchronous>, transform_indices = @transform_8, window_bounds = array<i64: 32, 16>}, {pipeline_mode = #tpu.pipeline_mode<synchronous>, transform_indices = @transform_9, window_bounds = array<i64: 1, 16>}, {pipeline_mode = #tpu.pipeline_mode<synchronous>, transform_indices = @transform_10, window_bounds = array<i64: 5, 16>}, {pipeline_mode = #tpu.pipeline_mode<synchronous>, transform_indices = @transform_11, window_bounds = array<i64: 2, 32>}]} {
    %c0 = arith.constant 0 : index
    %c0_0 = arith.constant 0 : index
    %0 = vector.load %arg4[%c0, %c0_0] : memref<2x32xf32, #tpu.memory_space<vmem>>, vector<1x32xf32>
    %c1 = arith.constant 1 : index
    %c0_1 = arith.constant 0 : index
    %1 = vector.load %arg4[%c1, %c0_1] : memref<2x32xf32, #tpu.memory_space<vmem>>, vector<1x32xf32>
    %c0_2 = arith.constant 0 : index
    %2 = memref.load %arg1[%c0_2] : memref<6xi32, #tpu.memory_space<smem>>
    %3 = arith.index_cast %2 : i32 to index
    %c0_3 = arith.constant 0 : index
    %4 = vector.load %arg3[%3, %c0_3] : memref<16x32xf32, #tpu.memory_space<vmem>>, vector<1x32xf32>
    %c0_4 = arith.constant 0 : index
    %c0_5 = arith.constant 0 : index
    %5 = vector.load %arg5[%c0_4, %c0_5] : memref<32x128xf32, #tpu.memory_space<vmem>>, vector<32x128xf32>
    %cst = arith.constant dense<0.000000e+00> : vector<1x128xf32>
    %6 = tpu.matmul %4, %5, %cst {dimension_numbers = #tpu.dot_dimension_numbers<[1], [0], [0], [1], [0, 0, 1, 1], [], []>} : vector<1x32xf32>, vector<32x128xf32>, vector<1x128xf32> -> vector<1x128xf32>
    %c0_6 = arith.constant 0 : index
    %c0_7 = arith.constant 0 : index
    %7 = vector.load %arg6[%c0_6, %c0_7] : memref<32x128xf32, #tpu.memory_space<vmem>>, vector<32x128xf32>
    %cst_8 = arith.constant dense<0.000000e+00> : vector<1x128xf32>
    %8 = tpu.matmul %0, %7, %cst_8 {dimension_numbers = #tpu.dot_dimension_numbers<[1], [0], [0], [1], [0, 0, 1, 1], [], []>} : vector<1x32xf32>, vector<32x128xf32>, vector<1x128xf32> -> vector<1x128xf32>
    %9 = arith.addf %6, %8 : vector<1x128xf32>
    %c0_9 = arith.constant 0 : index
    %c0_10 = arith.constant 0 : index
    %10 = vector.load %arg7[%c0_9, %c0_10] : memref<1x128xf32, #tpu.memory_space<vmem>>, vector<1x128xf32>
    %11 = arith.addf %9, %10 : vector<1x128xf32>
    %12 = arith.negf %11 : vector<1x128xf32>
    %13 = math.exp %12 : vector<1x128xf32>
    %cst_11 = arith.constant 1.000000e+00 : f32
    %14 = vector.broadcast %cst_11 : f32 to vector<1x128xf32>
    %15 = arith.addf %14, %13 : vector<1x128xf32>
    %16 = arith.divf %14, %15 : vector<1x128xf32>
    %17 = math.tanh %11 : vector<1x128xf32>
    %18 = vector.extract_strided_slice %16 {offsets = [0, 0], sizes = [1, 32], strides = [1, 1]} : vector<1x128xf32> to vector<1x32xf32>
    %19 = vector.extract_strided_slice %16 {offsets = [0, 32], sizes = [1, 32], strides = [1, 1]} : vector<1x128xf32> to vector<1x32xf32>
    %20 = vector.extract_strided_slice %17 {offsets = [0, 64], sizes = [1, 32], strides = [1, 1]} : vector<1x128xf32> to vector<1x32xf32>
    %21 = vector.extract_strided_slice %16 {offsets = [0, 96], sizes = [1, 32], strides = [1, 1]} : vector<1x128xf32> to vector<1x32xf32>
    %22 = arith.mulf %19, %1 : vector<1x32xf32>
    %23 = arith.mulf %18, %20 : vector<1x32xf32>
    %24 = arith.addf %22, %23 : vector<1x32xf32>
    %25 = math.tanh %24 : vector<1x32xf32>
    %26 = arith.mulf %21, %25 : vector<1x32xf32>
    %c1_12 = arith.constant 1 : index
    %27 = memref.load %arg1[%c1_12] : memref<6xi32, #tpu.memory_space<smem>>
    %28 = arith.index_cast %27 : i32 to index
    %c0_13 = arith.constant 0 : index
    %29 = vector.load %arg3[%28, %c0_13] : memref<16x32xf32, #tpu.memory_space<vmem>>, vector<1x32xf32>
    %c0_14 = arith.constant 0 : index
    %c0_15 = arith.constant 0 : index
    %30 = vector.load %arg5[%c0_14, %c0_15] : memref<32x128xf32, #tpu.memory_space<vmem>>, vector<32x128xf32>
    %cst_16 = arith.constant dense<0.000000e+00> : vector<1x128xf32>
    %31 = tpu.matmul %29, %30, %cst_16 {dimension_numbers = #tpu.dot_dimension_numbers<[1], [0], [0], [1], [0, 0, 1, 1], [], []>} : vector<1x32xf32>, vector<32x128xf32>, vector<1x128xf32> -> vector<1x128xf32>
    %c0_17 = arith.constant 0 : index
    %c0_18 = arith.constant 0 : index
    %32 = vector.load %arg6[%c0_17, %c0_18] : memref<32x128xf32, #tpu.memory_space<vmem>>, vector<32x128xf32>
    %cst_19 = arith.constant dense<0.000000e+00> : vector<1x128xf32>
    %33 = tpu.matmul %26, %32, %cst_19 {dimension_numbers = #tpu.dot_dimension_numbers<[1], [0], [0], [1], [0, 0, 1, 1], [], []>} : vector<1x32xf32>, vector<32x128xf32>, vector<1x128xf32> -> vector<1x128xf32>
    %34 = arith.addf %31, %33 : vector<1x128xf32>
    %c0_20 = arith.constant 0 : index
    %c0_21 = arith.constant 0 : index
    %35 = vector.load %arg7[%c0_20, %c0_21] : memref<1x128xf32, #tpu.memory_space<vmem>>, vector<1x128xf32>
    %36 = arith.addf %34, %35 : vector<1x128xf32>
    %37 = arith.negf %36 : vector<1x128xf32>
    %38 = math.exp %37 : vector<1x128xf32>
    %cst_22 = arith.constant 1.000000e+00 : f32
    %39 = vector.broadcast %cst_22 : f32 to vector<1x128xf32>
    %40 = arith.addf %39, %38 : vector<1x128xf32>
    %41 = arith.divf %39, %40 : vector<1x128xf32>
    %42 = math.tanh %36 : vector<1x128xf32>
    %43 = vector.extract_strided_slice %41 {offsets = [0, 0], sizes = [1, 32], strides = [1, 1]} : vector<1x128xf32> to vector<1x32xf32>
    %44 = vector.extract_strided_slice %41 {offsets = [0, 32], sizes = [1, 32], strides = [1, 1]} : vector<1x128xf32> to vector<1x32xf32>
    %45 = vector.extract_strided_slice %42 {offsets = [0, 64], sizes = [1, 32], strides = [1, 1]} : vector<1x128xf32> to vector<1x32xf32>
    %46 = vector.extract_strided_slice %41 {offsets = [0, 96], sizes = [1, 32], strides = [1, 1]} : vector<1x128xf32> to vector<1x32xf32>
    %47 = arith.mulf %44, %24 : vector<1x32xf32>
    %48 = arith.mulf %43, %45 : vector<1x32xf32>
    %49 = arith.addf %47, %48 : vector<1x32xf32>
    %50 = math.tanh %49 : vector<1x32xf32>
    %51 = arith.mulf %46, %50 : vector<1x32xf32>
    %c2 = arith.constant 2 : index
    %52 = memref.load %arg1[%c2] : memref<6xi32, #tpu.memory_space<smem>>
    %53 = arith.index_cast %52 : i32 to index
    %c0_23 = arith.constant 0 : index
    %54 = vector.load %arg3[%53, %c0_23] : memref<16x32xf32, #tpu.memory_space<vmem>>, vector<1x32xf32>
    %c0_24 = arith.constant 0 : index
    %c0_25 = arith.constant 0 : index
    %55 = vector.load %arg5[%c0_24, %c0_25] : memref<32x128xf32, #tpu.memory_space<vmem>>, vector<32x128xf32>
    %cst_26 = arith.constant dense<0.000000e+00> : vector<1x128xf32>
    %56 = tpu.matmul %54, %55, %cst_26 {dimension_numbers = #tpu.dot_dimension_numbers<[1], [0], [0], [1], [0, 0, 1, 1], [], []>} : vector<1x32xf32>, vector<32x128xf32>, vector<1x128xf32> -> vector<1x128xf32>
    %c0_27 = arith.constant 0 : index
    %c0_28 = arith.constant 0 : index
    %57 = vector.load %arg6[%c0_27, %c0_28] : memref<32x128xf32, #tpu.memory_space<vmem>>, vector<32x128xf32>
    %cst_29 = arith.constant dense<0.000000e+00> : vector<1x128xf32>
    %58 = tpu.matmul %51, %57, %cst_29 {dimension_numbers = #tpu.dot_dimension_numbers<[1], [0], [0], [1], [0, 0, 1, 1], [], []>} : vector<1x32xf32>, vector<32x128xf32>, vector<1x128xf32> -> vector<1x128xf32>
    %59 = arith.addf %56, %58 : vector<1x128xf32>
    %c0_30 = arith.constant 0 : index
    %c0_31 = arith.constant 0 : index
    %60 = vector.load %arg7[%c0_30, %c0_31] : memref<1x128xf32, #tpu.memory_space<vmem>>, vector<1x128xf32>
    %61 = arith.addf %59, %60 : vector<1x128xf32>
    %62 = arith.negf %61 : vector<1x128xf32>
    %63 = math.exp %62 : vector<1x128xf32>
    %cst_32 = arith.constant 1.000000e+00 : f32
    %64 = vector.broadcast %cst_32 : f32 to vector<1x128xf32>
    %65 = arith.addf %64, %63 : vector<1x128xf32>
    %66 = arith.divf %64, %65 : vector<1x128xf32>
    %67 = math.tanh %61 : vector<1x128xf32>
    %68 = vector.extract_strided_slice %66 {offsets = [0, 0], sizes = [1, 32], strides = [1, 1]} : vector<1x128xf32> to vector<1x32xf32>
    %69 = vector.extract_strided_slice %66 {offsets = [0, 32], sizes = [1, 32], strides = [1, 1]} : vector<1x128xf32> to vector<1x32xf32>
    %70 = vector.extract_strided_slice %67 {offsets = [0, 64], sizes = [1, 32], strides = [1, 1]} : vector<1x128xf32> to vector<1x32xf32>
    %71 = vector.extract_strided_slice %66 {offsets = [0, 96], sizes = [1, 32], strides = [1, 1]} : vector<1x128xf32> to vector<1x32xf32>
    %72 = arith.mulf %69, %49 : vector<1x32xf32>
    %73 = arith.mulf %68, %70 : vector<1x32xf32>
    %74 = arith.addf %72, %73 : vector<1x32xf32>
    %75 = math.tanh %74 : vector<1x32xf32>
    %76 = arith.mulf %71, %75 : vector<1x32xf32>
    %c3 = arith.constant 3 : index
    %77 = memref.load %arg1[%c3] : memref<6xi32, #tpu.memory_space<smem>>
    %78 = arith.index_cast %77 : i32 to index
    %c0_33 = arith.constant 0 : index
    %79 = vector.load %arg3[%78, %c0_33] : memref<16x32xf32, #tpu.memory_space<vmem>>, vector<1x32xf32>
    %c0_34 = arith.constant 0 : index
    %c0_35 = arith.constant 0 : index
    %80 = vector.load %arg5[%c0_34, %c0_35] : memref<32x128xf32, #tpu.memory_space<vmem>>, vector<32x128xf32>
    %cst_36 = arith.constant dense<0.000000e+00> : vector<1x128xf32>
    %81 = tpu.matmul %79, %80, %cst_36 {dimension_numbers = #tpu.dot_dimension_numbers<[1], [0], [0], [1], [0, 0, 1, 1], [], []>} : vector<1x32xf32>, vector<32x128xf32>, vector<1x128xf32> -> vector<1x128xf32>
    %c0_37 = arith.constant 0 : index
    %c0_38 = arith.constant 0 : index
    %82 = vector.load %arg6[%c0_37, %c0_38] : memref<32x128xf32, #tpu.memory_space<vmem>>, vector<32x128xf32>
    %cst_39 = arith.constant dense<0.000000e+00> : vector<1x128xf32>
    %83 = tpu.matmul %76, %82, %cst_39 {dimension_numbers = #tpu.dot_dimension_numbers<[1], [0], [0], [1], [0, 0, 1, 1], [], []>} : vector<1x32xf32>, vector<32x128xf32>, vector<1x128xf32> -> vector<1x128xf32>
    %84 = arith.addf %81, %83 : vector<1x128xf32>
    %c0_40 = arith.constant 0 : index
    %c0_41 = arith.constant 0 : index
    %85 = vector.load %arg7[%c0_40, %c0_41] : memref<1x128xf32, #tpu.memory_space<vmem>>, vector<1x128xf32>
    %86 = arith.addf %84, %85 : vector<1x128xf32>
    %87 = arith.negf %86 : vector<1x128xf32>
    %88 = math.exp %87 : vector<1x128xf32>
    %cst_42 = arith.constant 1.000000e+00 : f32
    %89 = vector.broadcast %cst_42 : f32 to vector<1x128xf32>
    %90 = arith.addf %89, %88 : vector<1x128xf32>
    %91 = arith.divf %89, %90 : vector<1x128xf32>
    %92 = math.tanh %86 : vector<1x128xf32>
    %93 = vector.extract_strided_slice %91 {offsets = [0, 0], sizes = [1, 32], strides = [1, 1]} : vector<1x128xf32> to vector<1x32xf32>
    %94 = vector.extract_strided_slice %91 {offsets = [0, 32], sizes = [1, 32], strides = [1, 1]} : vector<1x128xf32> to vector<1x32xf32>
    %95 = vector.extract_strided_slice %92 {offsets = [0, 64], sizes = [1, 32], strides = [1, 1]} : vector<1x128xf32> to vector<1x32xf32>
    %96 = vector.extract_strided_slice %91 {offsets = [0, 96], sizes = [1, 32], strides = [1, 1]} : vector<1x128xf32> to vector<1x32xf32>
    %97 = arith.mulf %94, %74 : vector<1x32xf32>
    %98 = arith.mulf %93, %95 : vector<1x32xf32>
    %99 = arith.addf %97, %98 : vector<1x32xf32>
    %100 = math.tanh %99 : vector<1x32xf32>
    %101 = arith.mulf %96, %100 : vector<1x32xf32>
    %c4 = arith.constant 4 : index
    %102 = memref.load %arg1[%c4] : memref<6xi32, #tpu.memory_space<smem>>
    %103 = arith.index_cast %102 : i32 to index
    %c0_43 = arith.constant 0 : index
    %104 = vector.load %arg3[%103, %c0_43] : memref<16x32xf32, #tpu.memory_space<vmem>>, vector<1x32xf32>
    %c0_44 = arith.constant 0 : index
    %c0_45 = arith.constant 0 : index
    %105 = vector.load %arg5[%c0_44, %c0_45] : memref<32x128xf32, #tpu.memory_space<vmem>>, vector<32x128xf32>
    %cst_46 = arith.constant dense<0.000000e+00> : vector<1x128xf32>
    %106 = tpu.matmul %104, %105, %cst_46 {dimension_numbers = #tpu.dot_dimension_numbers<[1], [0], [0], [1], [0, 0, 1, 1], [], []>} : vector<1x32xf32>, vector<32x128xf32>, vector<1x128xf32> -> vector<1x128xf32>
    %c0_47 = arith.constant 0 : index
    %c0_48 = arith.constant 0 : index
    %107 = vector.load %arg6[%c0_47, %c0_48] : memref<32x128xf32, #tpu.memory_space<vmem>>, vector<32x128xf32>
    %cst_49 = arith.constant dense<0.000000e+00> : vector<1x128xf32>
    %108 = tpu.matmul %101, %107, %cst_49 {dimension_numbers = #tpu.dot_dimension_numbers<[1], [0], [0], [1], [0, 0, 1, 1], [], []>} : vector<1x32xf32>, vector<32x128xf32>, vector<1x128xf32> -> vector<1x128xf32>
    %109 = arith.addf %106, %108 : vector<1x128xf32>
    %c0_50 = arith.constant 0 : index
    %c0_51 = arith.constant 0 : index
    %110 = vector.load %arg7[%c0_50, %c0_51] : memref<1x128xf32, #tpu.memory_space<vmem>>, vector<1x128xf32>
    %111 = arith.addf %109, %110 : vector<1x128xf32>
    %112 = arith.negf %111 : vector<1x128xf32>
    %113 = math.exp %112 : vector<1x128xf32>
    %cst_52 = arith.constant 1.000000e+00 : f32
    %114 = vector.broadcast %cst_52 : f32 to vector<1x128xf32>
    %115 = arith.addf %114, %113 : vector<1x128xf32>
    %116 = arith.divf %114, %115 : vector<1x128xf32>
    %117 = math.tanh %111 : vector<1x128xf32>
    %118 = vector.extract_strided_slice %116 {offsets = [0, 0], sizes = [1, 32], strides = [1, 1]} : vector<1x128xf32> to vector<1x32xf32>
    %119 = vector.extract_strided_slice %116 {offsets = [0, 32], sizes = [1, 32], strides = [1, 1]} : vector<1x128xf32> to vector<1x32xf32>
    %120 = vector.extract_strided_slice %117 {offsets = [0, 64], sizes = [1, 32], strides = [1, 1]} : vector<1x128xf32> to vector<1x32xf32>
    %121 = vector.extract_strided_slice %116 {offsets = [0, 96], sizes = [1, 32], strides = [1, 1]} : vector<1x128xf32> to vector<1x32xf32>
    %122 = arith.mulf %119, %99 : vector<1x32xf32>
    %123 = arith.mulf %118, %120 : vector<1x32xf32>
    %124 = arith.addf %122, %123 : vector<1x32xf32>
    %125 = math.tanh %124 : vector<1x32xf32>
    %126 = arith.mulf %121, %125 : vector<1x32xf32>
    %c5 = arith.constant 5 : index
    %127 = memref.load %arg1[%c5] : memref<6xi32, #tpu.memory_space<smem>>
    %128 = arith.index_cast %127 : i32 to index
    %c0_53 = arith.constant 0 : index
    %129 = vector.load %arg3[%128, %c0_53] : memref<16x32xf32, #tpu.memory_space<vmem>>, vector<1x32xf32>
    %c0_54 = arith.constant 0 : index
    %c0_55 = arith.constant 0 : index
    %130 = vector.load %arg5[%c0_54, %c0_55] : memref<32x128xf32, #tpu.memory_space<vmem>>, vector<32x128xf32>
    %cst_56 = arith.constant dense<0.000000e+00> : vector<1x128xf32>
    %131 = tpu.matmul %129, %130, %cst_56 {dimension_numbers = #tpu.dot_dimension_numbers<[1], [0], [0], [1], [0, 0, 1, 1], [], []>} : vector<1x32xf32>, vector<32x128xf32>, vector<1x128xf32> -> vector<1x128xf32>
    %c0_57 = arith.constant 0 : index
    %c0_58 = arith.constant 0 : index
    %132 = vector.load %arg6[%c0_57, %c0_58] : memref<32x128xf32, #tpu.memory_space<vmem>>, vector<32x128xf32>
    %cst_59 = arith.constant dense<0.000000e+00> : vector<1x128xf32>
    %133 = tpu.matmul %126, %132, %cst_59 {dimension_numbers = #tpu.dot_dimension_numbers<[1], [0], [0], [1], [0, 0, 1, 1], [], []>} : vector<1x32xf32>, vector<32x128xf32>, vector<1x128xf32> -> vector<1x128xf32>
    %134 = arith.addf %131, %133 : vector<1x128xf32>
    %c0_60 = arith.constant 0 : index
    %c0_61 = arith.constant 0 : index
    %135 = vector.load %arg7[%c0_60, %c0_61] : memref<1x128xf32, #tpu.memory_space<vmem>>, vector<1x128xf32>
    %136 = arith.addf %134, %135 : vector<1x128xf32>
    %137 = arith.negf %136 : vector<1x128xf32>
    %138 = math.exp %137 : vector<1x128xf32>
    %cst_62 = arith.constant 1.000000e+00 : f32
    %139 = vector.broadcast %cst_62 : f32 to vector<1x128xf32>
    %140 = arith.addf %139, %138 : vector<1x128xf32>
    %141 = arith.divf %139, %140 : vector<1x128xf32>
    %142 = math.tanh %136 : vector<1x128xf32>
    %143 = vector.extract_strided_slice %141 {offsets = [0, 0], sizes = [1, 32], strides = [1, 1]} : vector<1x128xf32> to vector<1x32xf32>
    %144 = vector.extract_strided_slice %141 {offsets = [0, 32], sizes = [1, 32], strides = [1, 1]} : vector<1x128xf32> to vector<1x32xf32>
    %145 = vector.extract_strided_slice %142 {offsets = [0, 64], sizes = [1, 32], strides = [1, 1]} : vector<1x128xf32> to vector<1x32xf32>
    %146 = vector.extract_strided_slice %141 {offsets = [0, 96], sizes = [1, 32], strides = [1, 1]} : vector<1x128xf32> to vector<1x32xf32>
    %147 = arith.mulf %144, %124 : vector<1x32xf32>
    %148 = arith.mulf %143, %145 : vector<1x32xf32>
    %149 = arith.addf %147, %148 : vector<1x32xf32>
    %150 = math.tanh %149 : vector<1x32xf32>
    %151 = arith.mulf %146, %150 : vector<1x32xf32>
    %c0_63 = arith.constant 0 : index
    %152 = memref.load %arg2[%c0_63] : memref<5xi32, #tpu.memory_space<smem>>
    %153 = arith.index_cast %152 : i32 to index
    %c0_64 = arith.constant 0 : index
    %154 = vector.load %arg3[%153, %c0_64] : memref<16x32xf32, #tpu.memory_space<vmem>>, vector<1x32xf32>
    %c0_65 = arith.constant 0 : index
    %c0_66 = arith.constant 0 : index
    %155 = vector.load %arg8[%c0_65, %c0_66] : memref<32x128xf32, #tpu.memory_space<vmem>>, vector<32x128xf32>
    %cst_67 = arith.constant dense<0.000000e+00> : vector<1x128xf32>
    %156 = tpu.matmul %154, %155, %cst_67 {dimension_numbers = #tpu.dot_dimension_numbers<[1], [0], [0], [1], [0, 0, 1, 1], [], []>} : vector<1x32xf32>, vector<32x128xf32>, vector<1x128xf32> -> vector<1x128xf32>
    %c0_68 = arith.constant 0 : index
    %c0_69 = arith.constant 0 : index
    %157 = vector.load %arg9[%c0_68, %c0_69] : memref<32x128xf32, #tpu.memory_space<vmem>>, vector<32x128xf32>
    %cst_70 = arith.constant dense<0.000000e+00> : vector<1x128xf32>
    %158 = tpu.matmul %151, %157, %cst_70 {dimension_numbers = #tpu.dot_dimension_numbers<[1], [0], [0], [1], [0, 0, 1, 1], [], []>} : vector<1x32xf32>, vector<32x128xf32>, vector<1x128xf32> -> vector<1x128xf32>
    %159 = arith.addf %156, %158 : vector<1x128xf32>
    %c0_71 = arith.constant 0 : index
    %c0_72 = arith.constant 0 : index
    %160 = vector.load %arg10[%c0_71, %c0_72] : memref<1x128xf32, #tpu.memory_space<vmem>>, vector<1x128xf32>
    %161 = arith.addf %159, %160 : vector<1x128xf32>
    %162 = arith.negf %161 : vector<1x128xf32>
    %163 = math.exp %162 : vector<1x128xf32>
    %cst_73 = arith.constant 1.000000e+00 : f32
    %164 = vector.broadcast %cst_73 : f32 to vector<1x128xf32>
    %165 = arith.addf %164, %163 : vector<1x128xf32>
    %166 = arith.divf %164, %165 : vector<1x128xf32>
    %167 = math.tanh %161 : vector<1x128xf32>
    %168 = vector.extract_strided_slice %166 {offsets = [0, 0], sizes = [1, 32], strides = [1, 1]} : vector<1x128xf32> to vector<1x32xf32>
    %169 = vector.extract_strided_slice %166 {offsets = [0, 32], sizes = [1, 32], strides = [1, 1]} : vector<1x128xf32> to vector<1x32xf32>
    %170 = vector.extract_strided_slice %167 {offsets = [0, 64], sizes = [1, 32], strides = [1, 1]} : vector<1x128xf32> to vector<1x32xf32>
    %171 = vector.extract_strided_slice %166 {offsets = [0, 96], sizes = [1, 32], strides = [1, 1]} : vector<1x128xf32> to vector<1x32xf32>
    %172 = arith.mulf %169, %149 : vector<1x32xf32>
    %173 = arith.mulf %168, %170 : vector<1x32xf32>
    %174 = arith.addf %172, %173 : vector<1x32xf32>
    %175 = math.tanh %174 : vector<1x32xf32>
    %176 = arith.mulf %171, %175 : vector<1x32xf32>
    %c0_74 = arith.constant 0 : index
    %c0_75 = arith.constant 0 : index
    %177 = vector.load %arg11[%c0_74, %c0_75] : memref<32x16xf32, #tpu.memory_space<vmem>>, vector<32x16xf32>
    %cst_76 = arith.constant dense<0.000000e+00> : vector<1x16xf32>
    %178 = tpu.matmul %176, %177, %cst_76 {dimension_numbers = #tpu.dot_dimension_numbers<[1], [0], [0], [1], [0, 0, 1, 1], [], []>} : vector<1x32xf32>, vector<32x16xf32>, vector<1x16xf32> -> vector<1x16xf32>
    %c0_77 = arith.constant 0 : index
    %c0_78 = arith.constant 0 : index
    %179 = vector.load %arg12[%c0_77, %c0_78] : memref<1x16xf32, #tpu.memory_space<vmem>>, vector<1x16xf32>
    %180 = arith.addf %178, %179 : vector<1x16xf32>
    %cst_79 = arith.constant dense<0xFF800000> : vector<1xf32>
    %181 = vector.multi_reduction <maximumf>, %180, %cst_79 [1] : vector<1x16xf32> to vector<1xf32>
    %182 = vector.shape_cast %181 : vector<1xf32> to vector<1x1xf32>
    %183 = vector.broadcast %182 : vector<1x1xf32> to vector<1x16xf32>
    %184 = arith.subf %180, %183 : vector<1x16xf32>
    %185 = math.exp %184 : vector<1x16xf32>
    %cst_80 = arith.constant dense<0.000000e+00> : vector<1xf32>
    %186 = vector.multi_reduction <add>, %185, %cst_80 [1] : vector<1x16xf32> to vector<1xf32>
    %187 = vector.shape_cast %186 : vector<1xf32> to vector<1x1xf32>
    %188 = math.log %187 : vector<1x1xf32>
    %189 = vector.broadcast %188 : vector<1x1xf32> to vector<1x16xf32>
    %190 = arith.subf %184, %189 : vector<1x16xf32>
    %c0_81 = arith.constant 0 : index
    %c0_82 = arith.constant 0 : index
    %191 = vector.load %arg13[%c0_81, %c0_82] : memref<5x16xf32, #tpu.memory_space<vmem>>, vector<1x16xf32>
    tpu.vector_store %arg13[%c0_81, %c0_82], %190 {strides = array<i32>} : memref<5x16xf32, #tpu.memory_space<vmem>>, vector<1x16xf32>,
    %c1_83 = arith.constant 1 : index
    %192 = memref.load %arg2[%c1_83] : memref<5xi32, #tpu.memory_space<smem>>
    %193 = arith.index_cast %192 : i32 to index
    %c0_84 = arith.constant 0 : index
    %194 = vector.load %arg3[%193, %c0_84] : memref<16x32xf32, #tpu.memory_space<vmem>>, vector<1x32xf32>
    %c0_85 = arith.constant 0 : index
    %c0_86 = arith.constant 0 : index
    %195 = vector.load %arg8[%c0_85, %c0_86] : memref<32x128xf32, #tpu.memory_space<vmem>>, vector<32x128xf32>
    %cst_87 = arith.constant dense<0.000000e+00> : vector<1x128xf32>
    %196 = tpu.matmul %194, %195, %cst_87 {dimension_numbers = #tpu.dot_dimension_numbers<[1], [0], [0], [1], [0, 0, 1, 1], [], []>} : vector<1x32xf32>, vector<32x128xf32>, vector<1x128xf32> -> vector<1x128xf32>
    %c0_88 = arith.constant 0 : index
    %c0_89 = arith.constant 0 : index
    %197 = vector.load %arg9[%c0_88, %c0_89] : memref<32x128xf32, #tpu.memory_space<vmem>>, vector<32x128xf32>
    %cst_90 = arith.constant dense<0.000000e+00> : vector<1x128xf32>
    %198 = tpu.matmul %176, %197, %cst_90 {dimension_numbers = #tpu.dot_dimension_numbers<[1], [0], [0], [1], [0, 0, 1, 1], [], []>} : vector<1x32xf32>, vector<32x128xf32>, vector<1x128xf32> -> vector<1x128xf32>
    %199 = arith.addf %196, %198 : vector<1x128xf32>
    %c0_91 = arith.constant 0 : index
    %c0_92 = arith.constant 0 : index
    %200 = vector.load %arg10[%c0_91, %c0_92] : memref<1x128xf32, #tpu.memory_space<vmem>>, vector<1x128xf32>
    %201 = arith.addf %199, %200 : vector<1x128xf32>
    %202 = arith.negf %201 : vector<1x128xf32>
    %203 = math.exp %202 : vector<1x128xf32>
    %cst_93 = arith.constant 1.000000e+00 : f32
    %204 = vector.broadcast %cst_93 : f32 to vector<1x128xf32>
    %205 = arith.addf %204, %203 : vector<1x128xf32>
    %206 = arith.divf %204, %205 : vector<1x128xf32>
    %207 = math.tanh %201 : vector<1x128xf32>
    %208 = vector.extract_strided_slice %206 {offsets = [0, 0], sizes = [1, 32], strides = [1, 1]} : vector<1x128xf32> to vector<1x32xf32>
    %209 = vector.extract_strided_slice %206 {offsets = [0, 32], sizes = [1, 32], strides = [1, 1]} : vector<1x128xf32> to vector<1x32xf32>
    %210 = vector.extract_strided_slice %207 {offsets = [0, 64], sizes = [1, 32], strides = [1, 1]} : vector<1x128xf32> to vector<1x32xf32>
    %211 = vector.extract_strided_slice %206 {offsets = [0, 96], sizes = [1, 32], strides = [1, 1]} : vector<1x128xf32> to vector<1x32xf32>
    %212 = arith.mulf %209, %174 : vector<1x32xf32>
    %213 = arith.mulf %208, %210 : vector<1x32xf32>
    %214 = arith.addf %212, %213 : vector<1x32xf32>
    %215 = math.tanh %214 : vector<1x32xf32>
    %216 = arith.mulf %211, %215 : vector<1x32xf32>
    %c0_94 = arith.constant 0 : index
    %c0_95 = arith.constant 0 : index
    %217 = vector.load %arg11[%c0_94, %c0_95] : memref<32x16xf32, #tpu.memory_space<vmem>>, vector<32x16xf32>
    %cst_96 = arith.constant dense<0.000000e+00> : vector<1x16xf32>
    %218 = tpu.matmul %216, %217, %cst_96 {dimension_numbers = #tpu.dot_dimension_numbers<[1], [0], [0], [1], [0, 0, 1, 1], [], []>} : vector<1x32xf32>, vector<32x16xf32>, vector<1x16xf32> -> vector<1x16xf32>
    %c0_97 = arith.constant 0 : index
    %c0_98 = arith.constant 0 : index
    %219 = vector.load %arg12[%c0_97, %c0_98] : memref<1x16xf32, #tpu.memory_space<vmem>>, vector<1x16xf32>
    %220 = arith.addf %218, %219 : vector<1x16xf32>
    %cst_99 = arith.constant dense<0xFF800000> : vector<1xf32>
    %221 = vector.multi_reduction <maximumf>, %220, %cst_99 [1] : vector<1x16xf32> to vector<1xf32>
    %222 = vector.shape_cast %221 : vector<1xf32> to vector<1x1xf32>
    %223 = vector.broadcast %222 : vector<1x1xf32> to vector<1x16xf32>
    %224 = arith.subf %220, %223 : vector<1x16xf32>
    %225 = math.exp %224 : vector<1x16xf32>
    %cst_100 = arith.constant dense<0.000000e+00> : vector<1xf32>
    %226 = vector.multi_reduction <add>, %225, %cst_100 [1] : vector<1x16xf32> to vector<1xf32>
    %227 = vector.shape_cast %226 : vector<1xf32> to vector<1x1xf32>
    %228 = math.log %227 : vector<1x1xf32>
    %229 = vector.broadcast %228 : vector<1x1xf32> to vector<1x16xf32>
    %230 = arith.subf %224, %229 : vector<1x16xf32>
    %c1_101 = arith.constant 1 : index
    %c0_102 = arith.constant 0 : index
    %231 = vector.load %arg13[%c1_101, %c0_102] : memref<5x16xf32, #tpu.memory_space<vmem>>, vector<1x16xf32>
    tpu.vector_store %arg13[%c1_101, %c0_102], %230 {strides = array<i32>} : memref<5x16xf32, #tpu.memory_space<vmem>>, vector<1x16xf32>,
    %c2_103 = arith.constant 2 : index
    %232 = memref.load %arg2[%c2_103] : memref<5xi32, #tpu.memory_space<smem>>
    %233 = arith.index_cast %232 : i32 to index
    %c0_104 = arith.constant 0 : index
    %234 = vector.load %arg3[%233, %c0_104] : memref<16x32xf32, #tpu.memory_space<vmem>>, vector<1x32xf32>
    %c0_105 = arith.constant 0 : index
    %c0_106 = arith.constant 0 : index
    %235 = vector.load %arg8[%c0_105, %c0_106] : memref<32x128xf32, #tpu.memory_space<vmem>>, vector<32x128xf32>
    %cst_107 = arith.constant dense<0.000000e+00> : vector<1x128xf32>
    %236 = tpu.matmul %234, %235, %cst_107 {dimension_numbers = #tpu.dot_dimension_numbers<[1], [0], [0], [1], [0, 0, 1, 1], [], []>} : vector<1x32xf32>, vector<32x128xf32>, vector<1x128xf32> -> vector<1x128xf32>
    %c0_108 = arith.constant 0 : index
    %c0_109 = arith.constant 0 : index
    %237 = vector.load %arg9[%c0_108, %c0_109] : memref<32x128xf32, #tpu.memory_space<vmem>>, vector<32x128xf32>
    %cst_110 = arith.constant dense<0.000000e+00> : vector<1x128xf32>
    %238 = tpu.matmul %216, %237, %cst_110 {dimension_numbers = #tpu.dot_dimension_numbers<[1], [0], [0], [1], [0, 0, 1, 1], [], []>} : vector<1x32xf32>, vector<32x128xf32>, vector<1x128xf32> -> vector<1x128xf32>
    %239 = arith.addf %236, %238 : vector<1x128xf32>
    %c0_111 = arith.constant 0 : index
    %c0_112 = arith.constant 0 : index
    %240 = vector.load %arg10[%c0_111, %c0_112] : memref<1x128xf32, #tpu.memory_space<vmem>>, vector<1x128xf32>
    %241 = arith.addf %239, %240 : vector<1x128xf32>
    %242 = arith.negf %241 : vector<1x128xf32>
    %243 = math.exp %242 : vector<1x128xf32>
    %cst_113 = arith.constant 1.000000e+00 : f32
    %244 = vector.broadcast %cst_113 : f32 to vector<1x128xf32>
    %245 = arith.addf %244, %243 : vector<1x128xf32>
    %246 = arith.divf %244, %245 : vector<1x128xf32>
    %247 = math.tanh %241 : vector<1x128xf32>
    %248 = vector.extract_strided_slice %246 {offsets = [0, 0], sizes = [1, 32], strides = [1, 1]} : vector<1x128xf32> to vector<1x32xf32>
    %249 = vector.extract_strided_slice %246 {offsets = [0, 32], sizes = [1, 32], strides = [1, 1]} : vector<1x128xf32> to vector<1x32xf32>
    %250 = vector.extract_strided_slice %247 {offsets = [0, 64], sizes = [1, 32], strides = [1, 1]} : vector<1x128xf32> to vector<1x32xf32>
    %251 = vector.extract_strided_slice %246 {offsets = [0, 96], sizes = [1, 32], strides = [1, 1]} : vector<1x128xf32> to vector<1x32xf32>
    %252 = arith.mulf %249, %214 : vector<1x32xf32>
    %253 = arith.mulf %248, %250 : vector<1x32xf32>
    %254 = arith.addf %252, %253 : vector<1x32xf32>
    %255 = math.tanh %254 : vector<1x32xf32>
    %256 = arith.mulf %251, %255 : vector<1x32xf32>
    %c0_114 = arith.constant 0 : index
    %c0_115 = arith.constant 0 : index
    %257 = vector.load %arg11[%c0_114, %c0_115] : memref<32x16xf32, #tpu.memory_space<vmem>>, vector<32x16xf32>
    %cst_116 = arith.constant dense<0.000000e+00> : vector<1x16xf32>
    %258 = tpu.matmul %256, %257, %cst_116 {dimension_numbers = #tpu.dot_dimension_numbers<[1], [0], [0], [1], [0, 0, 1, 1], [], []>} : vector<1x32xf32>, vector<32x16xf32>, vector<1x16xf32> -> vector<1x16xf32>
    %c0_117 = arith.constant 0 : index
    %c0_118 = arith.constant 0 : index
    %259 = vector.load %arg12[%c0_117, %c0_118] : memref<1x16xf32, #tpu.memory_space<vmem>>, vector<1x16xf32>
    %260 = arith.addf %258, %259 : vector<1x16xf32>
    %cst_119 = arith.constant dense<0xFF800000> : vector<1xf32>
    %261 = vector.multi_reduction <maximumf>, %260, %cst_119 [1] : vector<1x16xf32> to vector<1xf32>
    %262 = vector.shape_cast %261 : vector<1xf32> to vector<1x1xf32>
    %263 = vector.broadcast %262 : vector<1x1xf32> to vector<1x16xf32>
    %264 = arith.subf %260, %263 : vector<1x16xf32>
    %265 = math.exp %264 : vector<1x16xf32>
    %cst_120 = arith.constant dense<0.000000e+00> : vector<1xf32>
    %266 = vector.multi_reduction <add>, %265, %cst_120 [1] : vector<1x16xf32> to vector<1xf32>
    %267 = vector.shape_cast %266 : vector<1xf32> to vector<1x1xf32>
    %268 = math.log %267 : vector<1x1xf32>
    %269 = vector.broadcast %268 : vector<1x1xf32> to vector<1x16xf32>
    %270 = arith.subf %264, %269 : vector<1x16xf32>
    %c2_121 = arith.constant 2 : index
    %c0_122 = arith.constant 0 : index
    %271 = vector.load %arg13[%c2_121, %c0_122] : memref<5x16xf32, #tpu.memory_space<vmem>>, vector<1x16xf32>
    tpu.vector_store %arg13[%c2_121, %c0_122], %270 {strides = array<i32>} : memref<5x16xf32, #tpu.memory_space<vmem>>, vector<1x16xf32>,
    %c3_123 = arith.constant 3 : index
    %272 = memref.load %arg2[%c3_123] : memref<5xi32, #tpu.memory_space<smem>>
    %273 = arith.index_cast %272 : i32 to index
    %c0_124 = arith.constant 0 : index
    %274 = vector.load %arg3[%273, %c0_124] : memref<16x32xf32, #tpu.memory_space<vmem>>, vector<1x32xf32>
    %c0_125 = arith.constant 0 : index
    %c0_126 = arith.constant 0 : index
    %275 = vector.load %arg8[%c0_125, %c0_126] : memref<32x128xf32, #tpu.memory_space<vmem>>, vector<32x128xf32>
    %cst_127 = arith.constant dense<0.000000e+00> : vector<1x128xf32>
    %276 = tpu.matmul %274, %275, %cst_127 {dimension_numbers = #tpu.dot_dimension_numbers<[1], [0], [0], [1], [0, 0, 1, 1], [], []>} : vector<1x32xf32>, vector<32x128xf32>, vector<1x128xf32> -> vector<1x128xf32>
    %c0_128 = arith.constant 0 : index
    %c0_129 = arith.constant 0 : index
    %277 = vector.load %arg9[%c0_128, %c0_129] : memref<32x128xf32, #tpu.memory_space<vmem>>, vector<32x128xf32>
    %cst_130 = arith.constant dense<0.000000e+00> : vector<1x128xf32>
    %278 = tpu.matmul %256, %277, %cst_130 {dimension_numbers = #tpu.dot_dimension_numbers<[1], [0], [0], [1], [0, 0, 1, 1], [], []>} : vector<1x32xf32>, vector<32x128xf32>, vector<1x128xf32> -> vector<1x128xf32>
    %279 = arith.addf %276, %278 : vector<1x128xf32>
    %c0_131 = arith.constant 0 : index
    %c0_132 = arith.constant 0 : index
    %280 = vector.load %arg10[%c0_131, %c0_132] : memref<1x128xf32, #tpu.memory_space<vmem>>, vector<1x128xf32>
    %281 = arith.addf %279, %280 : vector<1x128xf32>
    %282 = arith.negf %281 : vector<1x128xf32>
    %283 = math.exp %282 : vector<1x128xf32>
    %cst_133 = arith.constant 1.000000e+00 : f32
    %284 = vector.broadcast %cst_133 : f32 to vector<1x128xf32>
    %285 = arith.addf %284, %283 : vector<1x128xf32>
    %286 = arith.divf %284, %285 : vector<1x128xf32>
    %287 = math.tanh %281 : vector<1x128xf32>
    %288 = vector.extract_strided_slice %286 {offsets = [0, 0], sizes = [1, 32], strides = [1, 1]} : vector<1x128xf32> to vector<1x32xf32>
    %289 = vector.extract_strided_slice %286 {offsets = [0, 32], sizes = [1, 32], strides = [1, 1]} : vector<1x128xf32> to vector<1x32xf32>
    %290 = vector.extract_strided_slice %287 {offsets = [0, 64], sizes = [1, 32], strides = [1, 1]} : vector<1x128xf32> to vector<1x32xf32>
    %291 = vector.extract_strided_slice %286 {offsets = [0, 96], sizes = [1, 32], strides = [1, 1]} : vector<1x128xf32> to vector<1x32xf32>
    %292 = arith.mulf %289, %254 : vector<1x32xf32>
    %293 = arith.mulf %288, %290 : vector<1x32xf32>
    %294 = arith.addf %292, %293 : vector<1x32xf32>
    %295 = math.tanh %294 : vector<1x32xf32>
    %296 = arith.mulf %291, %295 : vector<1x32xf32>
    %c0_134 = arith.constant 0 : index
    %c0_135 = arith.constant 0 : index
    %297 = vector.load %arg11[%c0_134, %c0_135] : memref<32x16xf32, #tpu.memory_space<vmem>>, vector<32x16xf32>
    %cst_136 = arith.constant dense<0.000000e+00> : vector<1x16xf32>
    %298 = tpu.matmul %296, %297, %cst_136 {dimension_numbers = #tpu.dot_dimension_numbers<[1], [0], [0], [1], [0, 0, 1, 1], [], []>} : vector<1x32xf32>, vector<32x16xf32>, vector<1x16xf32> -> vector<1x16xf32>
    %c0_137 = arith.constant 0 : index
    %c0_138 = arith.constant 0 : index
    %299 = vector.load %arg12[%c0_137, %c0_138] : memref<1x16xf32, #tpu.memory_space<vmem>>, vector<1x16xf32>
    %300 = arith.addf %298, %299 : vector<1x16xf32>
    %cst_139 = arith.constant dense<0xFF800000> : vector<1xf32>
    %301 = vector.multi_reduction <maximumf>, %300, %cst_139 [1] : vector<1x16xf32> to vector<1xf32>
    %302 = vector.shape_cast %301 : vector<1xf32> to vector<1x1xf32>
    %303 = vector.broadcast %302 : vector<1x1xf32> to vector<1x16xf32>
    %304 = arith.subf %300, %303 : vector<1x16xf32>
    %305 = math.exp %304 : vector<1x16xf32>
    %cst_140 = arith.constant dense<0.000000e+00> : vector<1xf32>
    %306 = vector.multi_reduction <add>, %305, %cst_140 [1] : vector<1x16xf32> to vector<1xf32>
    %307 = vector.shape_cast %306 : vector<1xf32> to vector<1x1xf32>
    %308 = math.log %307 : vector<1x1xf32>
    %309 = vector.broadcast %308 : vector<1x1xf32> to vector<1x16xf32>
    %310 = arith.subf %304, %309 : vector<1x16xf32>
    %c3_141 = arith.constant 3 : index
    %c0_142 = arith.constant 0 : index
    %311 = vector.load %arg13[%c3_141, %c0_142] : memref<5x16xf32, #tpu.memory_space<vmem>>, vector<1x16xf32>
    tpu.vector_store %arg13[%c3_141, %c0_142], %310 {strides = array<i32>} : memref<5x16xf32, #tpu.memory_space<vmem>>, vector<1x16xf32>,
    %c4_143 = arith.constant 4 : index
    %312 = memref.load %arg2[%c4_143] : memref<5xi32, #tpu.memory_space<smem>>
    %313 = arith.index_cast %312 : i32 to index
    %c0_144 = arith.constant 0 : index
    %314 = vector.load %arg3[%313, %c0_144] : memref<16x32xf32, #tpu.memory_space<vmem>>, vector<1x32xf32>
    %c0_145 = arith.constant 0 : index
    %c0_146 = arith.constant 0 : index
    %315 = vector.load %arg8[%c0_145, %c0_146] : memref<32x128xf32, #tpu.memory_space<vmem>>, vector<32x128xf32>
    %cst_147 = arith.constant dense<0.000000e+00> : vector<1x128xf32>
    %316 = tpu.matmul %314, %315, %cst_147 {dimension_numbers = #tpu.dot_dimension_numbers<[1], [0], [0], [1], [0, 0, 1, 1], [], []>} : vector<1x32xf32>, vector<32x128xf32>, vector<1x128xf32> -> vector<1x128xf32>
    %c0_148 = arith.constant 0 : index
    %c0_149 = arith.constant 0 : index
    %317 = vector.load %arg9[%c0_148, %c0_149] : memref<32x128xf32, #tpu.memory_space<vmem>>, vector<32x128xf32>
    %cst_150 = arith.constant dense<0.000000e+00> : vector<1x128xf32>
    %318 = tpu.matmul %296, %317, %cst_150 {dimension_numbers = #tpu.dot_dimension_numbers<[1], [0], [0], [1], [0, 0, 1, 1], [], []>} : vector<1x32xf32>, vector<32x128xf32>, vector<1x128xf32> -> vector<1x128xf32>
    %319 = arith.addf %316, %318 : vector<1x128xf32>
    %c0_151 = arith.constant 0 : index
    %c0_152 = arith.constant 0 : index
    %320 = vector.load %arg10[%c0_151, %c0_152] : memref<1x128xf32, #tpu.memory_space<vmem>>, vector<1x128xf32>
    %321 = arith.addf %319, %320 : vector<1x128xf32>
    %322 = arith.negf %321 : vector<1x128xf32>
    %323 = math.exp %322 : vector<1x128xf32>
    %cst_153 = arith.constant 1.000000e+00 : f32
    %324 = vector.broadcast %cst_153 : f32 to vector<1x128xf32>
    %325 = arith.addf %324, %323 : vector<1x128xf32>
    %326 = arith.divf %324, %325 : vector<1x128xf32>
    %327 = math.tanh %321 : vector<1x128xf32>
    %328 = vector.extract_strided_slice %326 {offsets = [0, 0], sizes = [1, 32], strides = [1, 1]} : vector<1x128xf32> to vector<1x32xf32>
    %329 = vector.extract_strided_slice %326 {offsets = [0, 32], sizes = [1, 32], strides = [1, 1]} : vector<1x128xf32> to vector<1x32xf32>
    %330 = vector.extract_strided_slice %327 {offsets = [0, 64], sizes = [1, 32], strides = [1, 1]} : vector<1x128xf32> to vector<1x32xf32>
    %331 = vector.extract_strided_slice %326 {offsets = [0, 96], sizes = [1, 32], strides = [1, 1]} : vector<1x128xf32> to vector<1x32xf32>
    %332 = arith.mulf %329, %294 : vector<1x32xf32>
    %333 = arith.mulf %328, %330 : vector<1x32xf32>
    %334 = arith.addf %332, %333 : vector<1x32xf32>
    %335 = math.tanh %334 : vector<1x32xf32>
    %336 = arith.mulf %331, %335 : vector<1x32xf32>
    %c0_154 = arith.constant 0 : index
    %c0_155 = arith.constant 0 : index
    %337 = vector.load %arg11[%c0_154, %c0_155] : memref<32x16xf32, #tpu.memory_space<vmem>>, vector<32x16xf32>
    %cst_156 = arith.constant dense<0.000000e+00> : vector<1x16xf32>
    %338 = tpu.matmul %336, %337, %cst_156 {dimension_numbers = #tpu.dot_dimension_numbers<[1], [0], [0], [1], [0, 0, 1, 1], [], []>} : vector<1x32xf32>, vector<32x16xf32>, vector<1x16xf32> -> vector<1x16xf32>
    %c0_157 = arith.constant 0 : index
    %c0_158 = arith.constant 0 : index
    %339 = vector.load %arg12[%c0_157, %c0_158] : memref<1x16xf32, #tpu.memory_space<vmem>>, vector<1x16xf32>
    %340 = arith.addf %338, %339 : vector<1x16xf32>
    %cst_159 = arith.constant dense<0xFF800000> : vector<1xf32>
    %341 = vector.multi_reduction <maximumf>, %340, %cst_159 [1] : vector<1x16xf32> to vector<1xf32>
    %342 = vector.shape_cast %341 : vector<1xf32> to vector<1x1xf32>
    %343 = vector.broadcast %342 : vector<1x1xf32> to vector<1x16xf32>
    %344 = arith.subf %340, %343 : vector<1x16xf32>
    %345 = math.exp %344 : vector<1x16xf32>
    %cst_160 = arith.constant dense<0.000000e+00> : vector<1xf32>
    %346 = vector.multi_reduction <add>, %345, %cst_160 [1] : vector<1x16xf32> to vector<1xf32>
    %347 = vector.shape_cast %346 : vector<1xf32> to vector<1x1xf32>
    %348 = math.log %347 : vector<1x1xf32>
    %349 = vector.broadcast %348 : vector<1x1xf32> to vector<1x16xf32>
    %350 = arith.subf %344, %349 : vector<1x16xf32>
    %c4_161 = arith.constant 4 : index
    %c0_162 = arith.constant 0 : index
    %351 = vector.load %arg13[%c4_161, %c0_162] : memref<5x16xf32, #tpu.memory_space<vmem>>, vector<1x16xf32>
    tpu.vector_store %arg13[%c4_161, %c0_162], %350 {strides = array<i32>} : memref<5x16xf32, #tpu.memory_space<vmem>>, vector<1x16xf32>,
    %c0_163 = arith.constant 0 : index
    %c0_164 = arith.constant 0 : index
    %352 = vector.load %arg14[%c0_163, %c0_164] : memref<2x32xf32, #tpu.memory_space<vmem>>, vector<1x32xf32>
    tpu.vector_store %arg14[%c0_163, %c0_164], %336 {strides = array<i32>} : memref<2x32xf32, #tpu.memory_space<vmem>>, vector<1x32xf32>,
    %c1_165 = arith.constant 1 : index
    %c0_166 = arith.constant 0 : index
    %353 = vector.load %arg14[%c1_165, %c0_166] : memref<2x32xf32, #tpu.memory_space<vmem>>, vector<1x32xf32>
    tpu.vector_store %arg14[%c1_165, %c0_166], %334 {strides = array<i32>} : memref<2x32xf32, #tpu.memory_space<vmem>>, vector<1x32xf32>,
    return
  }
  func.func @transform_0(%arg0: i32, %arg1: memref<6xi32, #tpu.memory_space<smem>>, %arg2: memref<5xi32, #tpu.memory_space<smem>>) -> (i32, i32) {
    %c0_i32 = arith.constant 0 : i32
    %c0_i32_0 = arith.constant 0 : i32
    %c0_i32_1 = arith.constant 0 : i32
    return %c0_i32, %c0_i32_0 : i32, i32
  }
  func.func @transform_1(%arg0: i32, %arg1: memref<6xi32, #tpu.memory_space<smem>>, %arg2: memref<5xi32, #tpu.memory_space<smem>>) -> (i32, i32) {
    %c0_i32 = arith.constant 0 : i32
    %c0_i32_0 = arith.constant 0 : i32
    %c0_i32_1 = arith.constant 0 : i32
    return %c0_i32, %c0_i32_0 : i32, i32
  }
  func.func @transform_2(%arg0: i32, %arg1: memref<6xi32, #tpu.memory_space<smem>>, %arg2: memref<5xi32, #tpu.memory_space<smem>>) -> (i32, i32) {
    %c0_i32 = arith.constant 0 : i32
    %c0_i32_0 = arith.constant 0 : i32
    %c0_i32_1 = arith.constant 0 : i32
    return %c0_i32, %c0_i32_0 : i32, i32
  }
  func.func @transform_3(%arg0: i32, %arg1: memref<6xi32, #tpu.memory_space<smem>>, %arg2: memref<5xi32, #tpu.memory_space<smem>>) -> (i32, i32) {
    %c0_i32 = arith.constant 0 : i32
    %c0_i32_0 = arith.constant 0 : i32
    %c0_i32_1 = arith.constant 0 : i32
    return %c0_i32, %c0_i32_0 : i32, i32
  }
  func.func @transform_4(%arg0: i32, %arg1: memref<6xi32, #tpu.memory_space<smem>>, %arg2: memref<5xi32, #tpu.memory_space<smem>>) -> (i32, i32) {
    %c0_i32 = arith.constant 0 : i32
    %c0_i32_0 = arith.constant 0 : i32
    %c0_i32_1 = arith.constant 0 : i32
    return %c0_i32, %c0_i32_0 : i32, i32
  }
  func.func @transform_5(%arg0: i32, %arg1: memref<6xi32, #tpu.memory_space<smem>>, %arg2: memref<5xi32, #tpu.memory_space<smem>>) -> (i32, i32) {
    %c0_i32 = arith.constant 0 : i32
    %c0_i32_0 = arith.constant 0 : i32
    %c0_i32_1 = arith.constant 0 : i32
    return %c0_i32, %c0_i32_0 : i32, i32
  }
  func.func @transform_6(%arg0: i32, %arg1: memref<6xi32, #tpu.memory_space<smem>>, %arg2: memref<5xi32, #tpu.memory_space<smem>>) -> (i32, i32) {
    %c0_i32 = arith.constant 0 : i32
    %c0_i32_0 = arith.constant 0 : i32
    %c0_i32_1 = arith.constant 0 : i32
    return %c0_i32, %c0_i32_0 : i32, i32
  }
  func.func @transform_7(%arg0: i32, %arg1: memref<6xi32, #tpu.memory_space<smem>>, %arg2: memref<5xi32, #tpu.memory_space<smem>>) -> (i32, i32) {
    %c0_i32 = arith.constant 0 : i32
    %c0_i32_0 = arith.constant 0 : i32
    %c0_i32_1 = arith.constant 0 : i32
    return %c0_i32, %c0_i32_0 : i32, i32
  }
  func.func @transform_8(%arg0: i32, %arg1: memref<6xi32, #tpu.memory_space<smem>>, %arg2: memref<5xi32, #tpu.memory_space<smem>>) -> (i32, i32) {
    %c0_i32 = arith.constant 0 : i32
    %c0_i32_0 = arith.constant 0 : i32
    %c0_i32_1 = arith.constant 0 : i32
    return %c0_i32, %c0_i32_0 : i32, i32
  }
  func.func @transform_9(%arg0: i32, %arg1: memref<6xi32, #tpu.memory_space<smem>>, %arg2: memref<5xi32, #tpu.memory_space<smem>>) -> (i32, i32) {
    %c0_i32 = arith.constant 0 : i32
    %c0_i32_0 = arith.constant 0 : i32
    %c0_i32_1 = arith.constant 0 : i32
    return %c0_i32, %c0_i32_0 : i32, i32
  }
  func.func @transform_10(%arg0: i32, %arg1: memref<6xi32, #tpu.memory_space<smem>>, %arg2: memref<5xi32, #tpu.memory_space<smem>>) -> (i32, i32) {
    %c0_i32 = arith.constant 0 : i32
    %c0_i32_0 = arith.constant 0 : i32
    %c0_i32_1 = arith.constant 0 : i32
    return %c0_i32, %c0_i32_0 : i32, i32
  }
  func.func @transform_11(%arg0: i32, %arg1: memref<6xi32, #tpu.memory_space<smem>>, %arg2: memref<5xi32, #tpu.memory_space<smem>>) -> (i32, i32) {
    %c0_i32 = arith.constant 0 : i32
    %c0_i32_0 = arith.constant 0 : i32
    %c0_i32_1 = arith.constant 0 : i32
    return %c0_i32, %c0_i32_0 : i32, i32
  }
}

</mosaic_0001>

<bundles_post_ra>
// kernel: tpu_custom_call.1
= control target key start
LH: loop header
LB: loop body
LE: loop exit
PB: predicated region body
PF: predicated region fallthrough
CT: control target
= control target key end

     0   :  { %s4107_s0 = inlined_call_operand.hbm [shape: s32[6], index: 0, kind: input, shape index: {}]   ;;  %s4108_s2 = inlined_call_operand.hbm [shape: f32[16,32], index: 2, kind: input, shape index: {}]   ;;  %s4109_s3 = inlined_call_operand.vmem [shape: f32[2,32], index: 3, kind: input, shape index: {}]   ;;  %s4110_s4 = inlined_call_operand.vmem [shape: f32[32,128], index: 4, kind: input, shape index: {}]   ;;  %s4111_s5 = inlined_call_operand.vmem [shape: f32[32,128], index: 5, kind: input, shape index: {}]   ;;  %s4112_s6 = inlined_call_operand.hbm [shape: f32[1,128], index: 6, kind: input, shape index: {}]   ;;  %s4113_s7 = inlined_call_operand.hbm [shape: f32[32,128], index: 7, kind: input, shape index: {}]   ;;  %s4114_s8 = inlined_call_operand.hbm [shape: f32[32,128], index: 8, kind: input, shape index: {}]   ;;  %s4115_s9 = inlined_call_operand.hbm [shape: f32[1,128], index: 9, kind: input, shape index: {}]   ;;  %s4116_s10 = inlined_call_operand.vmem [shape: f32[32,16], index: 10, kind: input, shape index: {}]   ;;  %s4117_s11 = inlined_call_operand.vmem [shape: f32[1,16], index: 11, kind: input, shape index: {}]   ;;  %s4118_s12 = inlined_call_operand.hbm [shape: f32[5,16], index: 12, kind: output, shape index: {0}]   ;;  %s4119_s13 = inlined_call_operand.hbm [shape: f32[2,32], index: 13, kind: output, shape index: {1}]   ;;  %s4120_s1 = inlined_call_operand.hbm [shape: s32[5], index: 1, kind: input, shape index: {}]  }
   0x1   :  { %s3368_s27 = scalar_lea.hbm %s4107_s0, 16 }
   0x2   :  { %p3369_p0 = scmp.ne.s32.totalorder %s4107_s0, %s3368_s27  ;;  %p3372_p1 = scmp.lt.u32.totalorder %s3368_s27, %s4107_s0 }
   0x4   :  { %p3374_p2 = pnand %p3372_p1, %p3369_p0 }
   0x6   :  { %3377 = shalt.err (!%p3374_p2)  }
   0x7   :  { %s3554_s15 = smov [#allocation3]   ;;  %s3378_s20 = scalar_lea.hbm %s4120_s1, 16 }
   0x8   :  { %20 = dma.hbm_to_smem %s4107_s0, 16, %s3554_s15, [#allocation2] }
   0x9   :  { %p3379_p3 = scmp.ne.s32.totalorder %s4120_s1, %s3378_s20  ;;  %p3382_p4 = scmp.lt.u32.totalorder %s3378_s20, %s4120_s1 }
   0xb   :  { %p3384_p5 = pnand %p3382_p4, %p3379_p3 }
   0xd   :  { %3387 = shalt.err (!%p3384_p5)  }
   0xe   :  { %s3555_s25 = smov [#allocation4]  }
   0xf   :  { %22 = dma.hbm_to_smem %s4120_s1, 16, %s3555_s25, [#allocation2] }
  0x10   :  { %3542 = dma.done.wait [#allocation2], 32 }
  0x11   :  { %3543 = vsyncadd [#allocation2], 4294967264 }
  0x12   :  { %24 = sfence }
  0x13   :  { %25 = vsyncpa [#allocation6], 0 }
  0x14   :  { %26 = vsyncpa [#allocation9], 0 }
  0x15   :  { %27 = vsyncpa [#allocation12], 0 }
  0x16   :  { %28 = vsyncpa [#allocation7], 0 }
  0x17   :  { %29 = vsyncpa [#allocation16], 0  ;;  %s3556_s0 = smov [#allocation8]   ;;  %s3388_s14 = scalar_lea.hbm %s4112_s6, 16 }
  0x18   :  { %s54_s28 = sshll.u32 %s3556_s0, 4  ;;  %p3389_p6 = scmp.ne.s32.totalorder %s4112_s6, %s3388_s14  ;;  %s55_s28 = int_to_ptr.vmem [resolvable:$true] %s54_s28 }
  0x19   :  { %p3392_p7 = scmp.lt.u32.totalorder %s3388_s14, %s4112_s6 }
  0x1b   :  { %p3394_p8 = pnand %p3392_p7, %p3389_p6 }
  0x1d   :  { %3397 = shalt.err (!%p3394_p8)
}
  0x1e   :  { %s3398_s18 = scalar_lea.vmem %s55_s28, 16  ;;  %s3402_s19 = scalar_lea.vmem %s55_s28, 32 }
  0x1f   :  { %p3399_p9 = scmp.ne.s32.totalorder %s55_s28, %s3398_s18  ;;  %p3403_p10 = scmp.lt.s32.totalorder %s55_s28, %s55_s28 }
  0x20   :  { %p3404_p11 = scmp.lt.s32.totalorder %s3402_s19, %s3398_s18 }
  0x22   :  { %p3405_p12 = por %p3404_p11, %p3403_p10 }
  0x24   :  { %p3406_p13 = pnand %p3405_p12, %p3399_p9 }
  0x26   :  { %3409 = shalt.err (!%p3406_p13)
}
  0x27   :  { %57 = dma.hbm_to_vmem [thread:$0]  %s4112_s6, 16, %s55_s28, [#allocation9]  }
  0x28   :  { %s3557_s22 = smov [#allocation11]   ;;  %s3558_s24 = smov [#allocation5]  }
  0x29   :  { %s75_s23 = sshll.u32 %s3557_s22, 4  ;;  %s35_s25 = sshll.u32 %s3558_s24, 4  ;;  %s76_s23 = int_to_ptr.vmem [resolvable:$true] %s75_s23  ;;  %s36_s25 = int_to_ptr.vmem [resolvable:$true] %s35_s25 }
  0x2a   :  { %s3410_s0 = scalar_lea.hbm %s4114_s8, 512 }
  0x2b   :  { %p3411_p0 = scmp.ne.s32.totalorder %s4114_s8, %s3410_s0  ;;  %p3414_p1 = scmp.lt.u32.totalorder %s3410_s0, %s4114_s8 }
  0x2d   :  { %p3416_p2 = pnand %p3414_p1, %p3411_p0 }
  0x2f   :  { %3419 = shalt.err (!%p3416_p2)
}
  0x30   :  { %s3420_s6 = scalar_lea.vmem %s76_s23, 512  ;;  %p3425_p4 = scmp.lt.s32.totalorder %s76_s23, %s76_s23 }
  0x31   :  { %p3421_p3 = scmp.ne.s32.totalorder %s76_s23, %s3420_s6  ;;  %p3426_p5 = scmp.lt.s32.totalorder %s3420_s6, %s3420_s6 }
  0x33   :  { %p3427_p6 = por %p3426_p5, %p3425_p4 }
  0x35   :  { %p3428_p7 = pnand %p3427_p6, %p3421_p3 }
  0x37   :  { %3431 = shalt.err (!%p3428_p7)
}
  0x38   :  { %s3559_s28 = smov 128   ;;  %s3560_s16 = smov 8  }
  0x39   :  { %81 = dma.hbm_to_vmem [thread:$0]  %s4114_s8, 512, %s76_s23, [#allocation12], %s3559_s28, %s3559_s28, %s3560_s16  }
  0x3a   :  { %s3432_s20 = scalar_lea.hbm %s4108_s2, 256 }
  0x3b   :  { %p3433_p8 = scmp.ne.s32.totalorder %s4108_s2, %s3432_s20  ;;  %p3436_p9 = scmp.lt.u32.totalorder %s3432_s20, %s4108_s2 }
  0x3d   :  { %p3438_p10 = pnand %p3436_p9, %p3433_p8 }
  0x3f   :  { %3441 = shalt.err (!%p3438_p10)
}
  0x40   :  { %s3442_s27 = scalar_lea.vmem %s36_s25, 256  ;;  %p3447_p12 = scmp.lt.s32.totalorder %s36_s25, %s36_s25 }
  0x41   :  { %p3443_p11 = scmp.ne.s32.totalorder %s36_s25, %s3442_s27  ;;  %p3448_p13 = scmp.lt.s32.totalorder %s3442_s27, %s3442_s27 }
  0x43   :  { %p3449_p0 = por %p3448_p13, %p3447_p12 }
  0x45   :  { %p3450_p1 = pnand %p3449_p0, %p3443_p11 }
  0x47   :  { %3453 = shalt.err (!%p3450_p1)
}
  0x48   :  { %41 = dma.hbm_to_vmem [thread:$0]  %s4108_s2, 256, %s36_s25, [#allocation6], %s3559_s28, %s3559_s28, %s3560_s16  }
  0x49   :  { %s3561_s0 = smov [#allocation10]   ;;  %s3562_s30 = smov [#allocation13]  }
  0x4a   :  { %s63_s29 = sshll.u32 %s3561_s0, 4  ;;  %s88_s14 = sshll.u32 %s3562_s30, 4  ;;  %s64_s29 = int_to_ptr.vmem [resolvable:$true] %s63_s29  ;;  %s89_s14 = int_to_ptr.vmem [resolvable:$true] %s88_s14 }
  0x4b   :  { %s3454_s1 = scalar_lea.hbm %s4113_s7, 512 }
  0x4c   :  { %p3455_p2 = scmp.ne.s32.totalorder %s4113_s7, %s3454_s1  ;;  %p3458_p3 = scmp.lt.u32.totalorder %s3454_s1, %s4113_s7 }
  0x4e   :  { %p3460_p4 = pnand %p3458_p3, %p3455_p2 }
  0x50   :  { %3463 = shalt.err (!%p3460_p4)
}
  0x51   :  { %s3464_s2 = scalar_lea.vmem %s64_s29, 512  ;;  %p3469_p6 = scmp.lt.s32.totalorder %s64_s29, %s64_s29 }
  0x52   :  { %p3465_p5 = scmp.ne.s32.totalorder %s64_s29, %s3464_s2  ;;  %p3470_p7 = scmp.lt.s32.totalorder %s3464_s2, %s3464_s2 }
  0x54   :  { %p3471_p8 = por %p3470_p7, %p3469_p6 }
  0x56   :  { %p3472_p9 = pnand %p3471_p8, %p3465_p5 }
  0x58   :  { %3475 = shalt.err (!%p3472_p9)
}
  0x59   :  { %69 = dma.hbm_to_vmem [thread:$0]  %s4113_s7, 512, %s64_s29, [#allocation9], %s3559_s28, %s3559_s28, %s3560_s16  }
  0x5a   :  { %s3476_s26 = scalar_lea.hbm %s4115_s9, 16 }
  0x5b   :  { %p3477_p10 = scmp.ne.s32.totalorder %s4115_s9, %s3476_s26  ;;  %p3480_p11 = scmp.lt.u32.totalorder %s3476_s26, %s4115_s9 }
  0x5d   :  { %p3482_p12 = pnand %p3480_p11, %p3477_p10 }
  0x5f   :  { %3485 = shalt.err (!%p3482_p12)
}
  0x60   :  { %s3486_s30 = scalar_lea.vmem %s89_s14, 16  ;;  %s3490_s15 = scalar_lea.vmem %s89_s14, 32 }
  0x61   :  { %p3487_p13 = scmp.ne.s32.totalorder %s89_s14, %s3486_s30  ;;  %p3491_p0 = scmp.lt.s32.totalorder %s89_s14, %s89_s14 }
  0x62   :  { %p3492_p1 = scmp.lt.s32.totalorder %s3490_s15, %s3486_s30 }
  0x64   :  { %p3493_p2 = por %p3492_p1, %p3491_p0 }
  0x66   :  { %p3494_p3 = pnand %p3493_p2, %p3487_p13 }
  0x68   :  { %3497 = shalt.err (!%p3494_p3)
}
  0x69   :  { %91 = dma.hbm_to_vmem [thread:$0]  %s4115_s9, 16, %s89_s14, [#allocation12]  }
  0x6a   :  { %3544 = dma.done.wait [#allocation6], 256  }
  0x6b   :  { %3545 = vsyncadd [#allocation6], 4294967040 }
  0x6c   :  { %3546 = dma.done.wait [#allocation9], 528  }
  0x6d   :  { %3547 = vsyncadd [#allocation9], 4294966768 }
  0x6e   :  { %3548 = dma.done.wait [#allocation12], 528  }
  0x6f   :  { %3549 = vsyncadd [#allocation12], 4294966768  ;;  %v3563_v0 = vmov 0.0|0.0   ;;  %vm3564_vm0 = vmmov 0   ;;  %v3565_v1 = vmov 0.0   ;;  %s113_s9 = sld [smem:[#allocation3]] }
  0x70   :  { %3081 = vmatprep.subr.bf16.mxu0 %v3563_v0  ;;  %3087 = vmatprep.subr.bf16.mxu1 %v3563_v0  ;;  %v120_v2 = vld [vmem:[%s4111_s5] sm:$0xff]  ;;  %v121_v3 = vld [vmem:[%s4111_s5 + $0x8] sm:$0xff]  ;;  %v122_v7 = vld [vmem:[%s4111_s5 + $0x10] sm:$0xff]  ;;  %vm124_vm1 = vcmask 261120   ;;  %s3566_s23 = smov 64   ;;  %s3567_s15 = smov 32  }
  0x71   :  { %2792 = vmatprep.mubr.msk.f32.mxu0 %vm3564_vm0, %v3565_v1  ;;  %2803 = vmatprep.mubr.msk.f32.mxu1 %vm3564_vm0, %v3565_v1  ;;  %v116_v4 = vld [vmem:[%s4110_s4] sm:$0xff]  ;;  %v3749_v5 = vpack.c.bf16 %v121_v3, %v120_v2  ;;  %v117_v6 = vld [vmem:[%s4110_s4 + $0x8] sm:$0xff]  ;;  %v123_v8 = vld [vmem:[%s4111_s5 + $0x18] sm:$0xff]  ;;  %s2605_s7 = sld [smem:[#allocation3 + $0x1]]  ;;  %s2609_s28 = sld [smem:[#allocation3 + $0x2]]  ;;  %vm1446_vm2 = vcmask 122880  }
  0x72   :  { %v3760_v9 = vpack.c.bf16 %v117_v6, %v116_v4  ;;  %v118_v10 = vld [vmem:[%s4110_s4 + $0x10] sm:$0xff]  ;;  %v119_v11 = vld [vmem:[%s4110_s4 + $0x18] sm:$0xff]  ;;  %v3769_v12 = vpack.c.bf16 %v123_v8, %v122_v7  ;;  %v111_v14 = vld [vmem:[%s4109_s3] sm:$0x1]  ;;  %s2613_s16 = sld [smem:[#allocation3 + $0x3]]  ;;  %s2617_s14 = sld [smem:[#allocation3 + $0x4]] }
  0x73   :  { %3083 = vmatpush3.bf16.msra.mxu0 %v3749_v5  ;;  %v3773_v13 = vpack.c.bf16 %v119_v11, %v118_v10  ;;  %v3797_v18 = vld [vmem:[#allocation8] sm:$0x1]  ;;  %v112_v24 = vld [vmem:[%s4109_s3 + $0x1] sm:$0x1]  ;;  %s2621_s1 = sld [smem:[#allocation3 + $0x5]]  ;;  %s1181_s18 = sld [smem:[#allocation4]] }
  0x74   :  { %3089 = vmatpush3.bf16.msra.mxu1 %v3760_v9  ;;  %3084 = vmatprep.subr.bf16.mxu0 %v3563_v0  ;;  %s2629_s5 = sld [smem:[#allocation4 + $0x1]]  ;;  %s2634_s8 = sld [smem:[#allocation4 + $0x2]]  ;;  %vm2553_vm3 = vcmask 253952  }
  0x75   :  { %3090 = vmatprep.subr.bf16.mxu1 %v3563_v0  ;;  %s114_s4 = scalar_lea.vmem [#allocation5], %s113_s9  ;;  %s2639_s0 = sld [smem:[#allocation4 + $0x3]] }
  0x76   :  { %v115_v15 = vld [vmem:[%s114_s4] sm:$0x1] }
  0x77   :  { %3086 = vmatpush3.bf16.msra.mxu0 %v3769_v12  ;;  %s302_s3 = scalar_lea.vmem [#allocation5], %s2605_s7  ;;  %s478_s9 = scalar_lea.vmem [#allocation5], %s2609_s28 }
  0x78   :  { %3092 = vmatpush3.bf16.msra.mxu1 %v3773_v13  ;;  %3093 = vmatprep.subr.bf16.mxu0 %v3563_v0  ;;  %v303_v35 = vld [vmem:[%s302_s3] sm:$0x1]  ;;  %s654_s29 = scalar_lea.vmem [#allocation5], %s2613_s16  ;;  %s830_s6 = scalar_lea.vmem [#allocation5], %s2617_s14 }
  0x79   :  { %3099 = vmatprep.subr.bf16.mxu1 %v3563_v0  ;;  %v479_v56 = vld [vmem:[%s478_s9] sm:$0x1]  ;;  %s1006_s17 = scalar_lea.vmem [#allocation5], %s2621_s1  ;;  %s1182_s19 = scalar_lea.vmem [#allocation5], %s1181_s18 }
  0x7a   :  { %2793 = vmatmul.mubr.msk.f32.vlgmr.msra.gmra.mrb[0].mxu0 %vm124_vm1, %v111_v14  ;;  %s1734_s4 = scalar_lea.vmem [#allocation5], %s2634_s8  ;;  %s2644_s7 = sld [smem:[#allocation4 + $0x4]] }
  0x7b   :  { %2804 = vmatmul.mubr.msk.f32.vlgmr.msra.gmra.mrb[0].mxu1 %vm124_vm1, %v115_v15  ;;  %3095 = vmatpush3.bf16.msra.mxu0 %v3749_v5  ;;  %s2007_s30 = scalar_lea.vmem [#allocation5], %s2639_s0  ;;  %s3569_s18 = smov [#allocation15]  }
  0x7c   :  { %3101 = vmatpush3.bf16.msra.mxu1 %v3760_v9  ;;  %3096 = vmatprep.subr.bf16.mxu0 %v3563_v0 }
  0x7d   :  { %3102 = vmatprep.subr.bf16.mxu1 %v3563_v0  ;;  %2825 = vmatprep.mubr.msk.f32.mxu1 %vm3564_vm0, %v3565_v1 }
  0x7e   :  { %2814 = vmatprep.mubr.msk.f32.mxu0 %vm3564_vm0, %v3565_v1 }
  0x7f   :  { %3098 = vmatpush3.bf16.msra.mxu0 %v3769_v12 }
  0x80   :  { %3104 = vmatpush3.bf16.msra.mxu1 %v3773_v13  ;;  %3105 = vmatprep.subr.bf16.mxu0 %v3563_v0  ;;  %s2280_s3 = scalar_lea.vmem [#allocation5], %s2644_s7 }
  0x81   :  { %3111 = vmatprep.subr.bf16.mxu1 %v3563_v0 }
  0x83   :  { %2826 = vmatmul.mubr.msk.f32.vlgmr.msra.gmra.mrb[2].mxu1 %vm124_vm1, %v303_v35 }
  0x84   :  { %3113 = vmatpush3.bf16.msra.mxu1 %v3760_v9  ;;  %2847 = vmatprep.mubr.msk.f32.mxu1 %vm3564_vm0, %v3565_v1 }
  0x85   :  { %3114 = vmatprep.subr.bf16.mxu1 %v3563_v0 }
  0x88   :  { %3116 = vmatpush3.bf16.msra.mxu1 %v3773_v13 }
  0x89   :  { %3123 = vmatprep.subr.bf16.mxu1 %v3563_v0 }
  0x8b   :  { %2848 = vmatmul.mubr.msk.f32.vlgmr.msra.gmra.mrb[4].mxu1 %vm124_vm1, %v479_v56 }
  0x8c   :  { %3125 = vmatpush3.bf16.msra.mxu1 %v3760_v9  ;;  %2869 = vmatprep.mubr.msk.f32.mxu1 %vm3564_vm0, %v3565_v1 }
  0x8d   :  { %3126 = vmatprep.subr.bf16.mxu1 %v3563_v0 }
  0x90   :  { %3128 = vmatpush3.bf16.msra.mxu1 %v3773_v13 }
  0x91   :  { %3135 = vmatprep.subr.bf16.mxu1 %v3563_v0 }
 0x14d   :  { %v194_v16 = vpop.f32.mrb[0].mxu0 }
 0x14e   :  { %v267_v17 = vpop.f32.mrb[0].mxu1  ;;  %v2794_v19 = vpop.f32.mrb[1].mxu0 }
 0x14f   :  { %v268_v20 = vadd.f32 %v267_v17, %v194_v16  ;;  %v2805_v21 = vpop.f32.mrb[1].mxu1 }
 0x151   :  { %v272_v22 = vadd.f32 %v3797_v18, %v268_v20  ;;  %v655_v20 = vld [vmem:[%s654_s29] sm:$0x1] }
 0x152   :  { %2870 = vmatmul.mubr.msk.f32.vlgmr.msra.gmra.mrb[6].mxu1 %vm124_vm1, %v655_v20 }
 0x153   :  { %3260 = vtanh.f32 %v272_v22  ;;  %v2604_v25 = vmul.f32 -1.442695, %v272_v22  ;;  %3137 = vmatpush3.bf16.msra.mxu1 %v3760_v9  ;;  %2891 = vmatprep.mubr.msk.f32.mxu1 %vm3564_vm0, %v3565_v1 }
 0x154   :  { %3138 = vmatprep.subr.bf16.mxu1 %v3563_v0 }
 0x155   :  { %3262 = vpow2.f32 %v2604_v25 }
 0x156   :  { %v448_v39 = vpop.f32.mrb[2].mxu1 }
 0x157   :  { %v2827_v40 = vpop.f32.mrb[3].mxu1  ;;  %3140 = vmatpush3.bf16.msra.mxu1 %v3773_v13 }
 0x158   :  { %3147 = vmatprep.subr.bf16.mxu1 %v3563_v0 }
 0x15d   :  { %v3261_v23 = vpop.eup %3260 }
 0x15e   :  { %286 = vrot.lane.b32.xlu0 %v3261_v23, %s3566_s23  ;;  %v624_v60 = vpop.f32.mrb[4].mxu1 }
 0x15f   :  { %v3263_v26 = vpop.eup %3262  ;;  %v2849_v61 = vpop.f32.mrb[5].mxu1 }
 0x160   :  { %v276_v27 = vadd.f32 1.0, %v3263_v26 }
 0x162   :  { %281 = vrot.lane.b32.xlu0 %v112_v24, %s3567_s15  ;;  %3264 = vrcp.f32 %v276_v27 }
 0x16c   :  { %v3265_v28 = vpop.eup %3264 }
 0x1d0   :  { %v287_v29 = vpop.permute.xlu0 %286 }
 0x1d1   :  { %v289_v30 = vmul.f32 %v3265_v28, %v287_v29 }
 0x1d3   :  { %291 = vrot.lane.b32.xlu1 %v289_v30, %s3567_s15 }
 0x1d4   :  { %v282_v31 = vpop.permute.xlu0 %281 }
 0x1d5   :  { %v284_v32 = vmul.f32 %v3265_v28, %v282_v31 }
 0x225   :  { %v800_v24 = vpop.f32.mrb[6].mxu1 }
 0x226   :  { %v2871_v25 = vpop.f32.mrb[7].mxu1 }
 0x227   :  { %v1189_v25 = vld [vmem:[#allocation11 + $0x8] sm:$0xff] }
 0x245   :  { %v292_v33 = vpop.permute.xlu1 %291 }
 0x246   :  { %v294_v34 = vadd.f32 %v292_v33, %v284_v32 }
 0x248   :  { %3266 = vtanh.f32 %v294_v34 }
 0x252   :  { %v3267_v36 = vpop.eup %3266 }
 0x253   :  { %297 = vrot.lane.b32.xlu1 %v3267_v36, %s3566_s23 }
 0x2c5   :  { %v298_v37 = vpop.permute.xlu1 %297 }
 0x2c6   :  { %v300_v38 = vmul.f32 %v3265_v28, %v298_v37 }
 0x2c8   :  { %305 = vrot.lane.b32.xlu0 %v300_v38, %s3567_s15 }
 0x33a   :  { %v306_v41 = vpop.permute.xlu0 %305 }
 0x33b   :  { %2815 = vmatmul.mubr.msk.f32.vlgmr.msra.gmra.mrb[2].mxu0 %vm124_vm1, %v306_v41  ;;  %v831_v41 = vld [vmem:[%s830_s6] sm:$0x1] }
 0x33c   :  { %3107 = vmatpush3.bf16.msra.mxu0 %v3749_v5  ;;  %2836 = vmatprep.mubr.msk.f32.mxu0 %vm3564_vm0, %v3565_v1 }
 0x33d   :  { %3108 = vmatprep.subr.bf16.mxu0 %v3563_v0  ;;  %2892 = vmatmul.mubr.msk.f32.vlgmr.msra.gmra.mrb[8].mxu1 %vm124_vm1, %v831_v41  ;;  %v1340_v41 = vld [vmem:[#allocation13] sm:$0x1] }
 0x33e   :  { %3149 = vmatpush3.bf16.msra.mxu1 %v3760_v9  ;;  %2913 = vmatprep.mubr.msk.f32.mxu1 %vm3564_vm0, %v3565_v1 }
 0x33f   :  { %3150 = vmatprep.subr.bf16.mxu1 %v3563_v0 }
 0x340   :  { %3110 = vmatpush3.bf16.msra.mxu0 %v3769_v12 }
 0x341   :  { %3117 = vmatprep.subr.bf16.mxu0 %v3563_v0 }
 0x342   :  { %3152 = vmatpush3.bf16.msra.mxu1 %v3773_v13 }
 0x343   :  { %3159 = vmatprep.subr.bf16.mxu1 %v3563_v0 }
 0x40e   :  { %v375_v42 = vpop.f32.mrb[2].mxu0 }
 0x40f   :  { %v449_v43 = vadd.f32 %v448_v39, %v375_v42  ;;  %v2816_v44 = vpop.f32.mrb[3].mxu0 }
 0x411   :  { %v452_v45 = vadd.f32 %v449_v43, %v3797_v18 }
 0x413   :  { %3268 = vtanh.f32 %v452_v45  ;;  %v2608_v47 = vmul.f32 -1.442695, %v452_v45  ;;  %v976_v45 = vpop.f32.mrb[8].mxu1 }
 0x415   :  { %3270 = vpow2.f32 %v2608_v47 }
 0x41d   :  { %v3269_v46 = vpop.eup %3268 }
 0x41e   :  { %462 = vrot.lane.b32.xlu1 %v3269_v46, %s3566_s23  ;;  %v2893_v46 = vpop.f32.mrb[9].mxu1 }
 0x41f   :  { %v3271_v48 = vpop.eup %3270 }
 0x420   :  { %v456_v49 = vadd.f32 1.0, %v3271_v48 }
 0x422   :  { %3272 = vrcp.f32 %v456_v49 }
 0x42c   :  { %v3273_v50 = vpop.eup %3272 }
 0x42d   :  { %v460_v53 = vmul.f32 %v3273_v50, %v294_v34 }
 0x490   :  { %v463_v51 = vpop.permute.xlu1 %462 }
 0x491   :  { %v465_v52 = vmul.f32 %v3273_v50, %v463_v51 }
 0x493   :  { %467 = vrot.lane.b32.xlu0 %v465_v52, %s3567_s15 }
 0x505   :  { %v468_v54 = vpop.permute.xlu0 %467 }
 0x506   :  { %v470_v55 = vadd.f32 %v468_v54, %v460_v53 }
 0x508   :  { %3274 = vtanh.f32 %v470_v55 }
 0x512   :  { %v3275_v57 = vpop.eup %3274 }
 0x513   :  { %473 = vrot.lane.b32.xlu1 %v3275_v57, %s3566_s23 }
 0x585   :  { %v474_v58 = vpop.permute.xlu1 %473 }
 0x586   :  { %v476_v59 = vmul.f32 %v3273_v50, %v474_v58  ;;  %v1007_v58 = vld [vmem:[%s1006_s17] sm:$0x1] }
 0x587   :  { %2914 = vmatmul.mubr.msk.f32.vlgmr.msra.gmra.mrb[10].mxu1 %vm124_vm1, %v1007_v58 }
 0x588   :  { %481 = vrot.lane.b32.xlu0 %v476_v59, %s3567_s15  ;;  %2935 = vmatprep.mubr.msk.f32.mxu1 %vm3564_vm0, %v3565_v1 }
 0x5fa   :  { %v482_v62 = vpop.permute.xlu0 %481 }
 0x5fb   :  { %2837 = vmatmul.mubr.msk.f32.vlgmr.msra.gmra.mrb[4].mxu0 %vm124_vm1, %v482_v62 }
 0x5fc   :  { %3119 = vmatpush3.bf16.msra.mxu0 %v3749_v5  ;;  %2858 = vmatprep.mubr.msk.f32.mxu0 %vm3564_vm0, %v3565_v1 }
 0x5fd   :  { %3120 = vmatprep.subr.bf16.mxu0 %v3563_v0 }
 0x600   :  { %3122 = vmatpush3.bf16.msra.mxu0 %v3769_v12 }
 0x601   :  { %3129 = vmatprep.subr.bf16.mxu0 %v3563_v0 }
 0x65a   :  { %v1152_v62 = vpop.f32.mrb[10].mxu1 }
 0x6ce   :  { %v551_v63 = vpop.f32.mrb[4].mxu0 }
 0x6cf   :  { %v625_v2 = vadd.f32 %v624_v60, %v551_v63  ;;  %v2838_v3 = vpop.f32.mrb[5].mxu0  ;;  %v2915_v63 = vpop.f32.mrb[11].mxu1 }
 0x6d1   :  { %v628_v4 = vadd.f32 %v625_v2, %v3797_v18 }
 0x6d3   :  { %3276 = vtanh.f32 %v628_v4  ;;  %v2612_v7 = vmul.f32 -1.442695, %v628_v4 }
 0x6d5   :  { %3278 = vpow2.f32 %v2612_v7 }
 0x6dd   :  { %v3277_v6 = vpop.eup %3276 }
 0x6de   :  { %638 = vrot.lane.b32.xlu1 %v3277_v6, %s3566_s23 }
 0x6df   :  { %v3279_v8 = vpop.eup %3278 }
 0x6e0   :  { %v632_v10 = vadd.f32 1.0, %v3279_v8 }
 0x6e2   :  { %3280 = vrcp.f32 %v632_v10 }
 0x6ec   :  { %v3281_v11 = vpop.eup %3280 }
 0x6ed   :  { %v636_v16 = vmul.f32 %v3281_v11, %v470_v55 }
 0x750   :  { %v639_v14 = vpop.permute.xlu1 %638 }
 0x751   :  { %v641_v15 = vmul.f32 %v3281_v11, %v639_v14 }
 0x753   :  { %643 = vrot.lane.b32.xlu0 %v641_v15, %s3567_s15 }
 0x7c5   :  { %v644_v17 = vpop.permute.xlu0 %643 }
 0x7c6   :  { %v646_v19 = vadd.f32 %v644_v17, %v636_v16 }
 0x7c8   :  { %3282 = vtanh.f32 %v646_v19 }
 0x7d2   :  { %v3283_v21 = vpop.eup %3282 }
 0x7d3   :  { %649 = vrot.lane.b32.xlu1 %v3283_v21, %s3566_s23 }
 0x845   :  { %v650_v22 = vpop.permute.xlu1 %649 }
 0x846   :  { %v652_v23 = vmul.f32 %v3281_v11, %v650_v22  ;;  %v1184_v22 = vld [vmem:[#allocation10] sm:$0xff] }
 0x848   :  { %657 = vrot.lane.b32.xlu0 %v652_v23, %s3567_s15  ;;  %v1188_v23 = vld [vmem:[#allocation11] sm:$0xff] }
 0x8ba   :  { %v658_v26 = vpop.permute.xlu0 %657 }
 0x8bb   :  { %2859 = vmatmul.mubr.msk.f32.vlgmr.msra.gmra.mrb[6].mxu0 %vm124_vm1, %v658_v26  ;;  %v1186_v26 = vld [vmem:[#allocation10 + $0x10] sm:$0xff] }
 0x8bc   :  { %3131 = vmatpush3.bf16.msra.mxu0 %v3749_v5  ;;  %2880 = vmatprep.mubr.msk.f32.mxu0 %vm3564_vm0, %v3565_v1 }
 0x8bd   :  { %3132 = vmatprep.subr.bf16.mxu0 %v3563_v0 }
 0x8c0   :  { %3134 = vmatpush3.bf16.msra.mxu0 %v3769_v12 }
 0x8c1   :  { %3141 = vmatprep.subr.bf16.mxu0 %v3563_v0 }
 0x98e   :  { %v727_v27 = vpop.f32.mrb[6].mxu0 }
 0x98f   :  { %v801_v28 = vadd.f32 %v800_v24, %v727_v27  ;;  %v2860_v29 = vpop.f32.mrb[7].mxu0  ;;  %v1187_v27 = vld [vmem:[#allocation10 + $0x18] sm:$0xff] }
 0x990   :  { %v1190_v29 = vld [vmem:[#allocation11 + $0x10] sm:$0xff] }
 0x991   :  { %v804_v30 = vadd.f32 %v801_v28, %v3797_v18  ;;  %v3895_v28 = vpack.c.bf16 %v1189_v25, %v1188_v23 }
 0x993   :  { %3284 = vtanh.f32 %v804_v30  ;;  %v2616_v32 = vmul.f32 -1.442695, %v804_v30  ;;  %v1191_v30 = vld [vmem:[#allocation11 + $0x18] sm:$0xff] }
 0x995   :  { %3286 = vpow2.f32 %v2616_v32  ;;  %v3902_v32 = vpack.c.bf16 %v1191_v30, %v1190_v29  ;;  %v1735_v29 = vld [vmem:[%s1734_s4] sm:$0x1] }
 0x99d   :  { %v3285_v31 = vpop.eup %3284 }
 0x99e   :  { %814 = vrot.lane.b32.xlu1 %v3285_v31, %s3566_s23  ;;  %v3898_v31 = vpack.c.bf16 %v1187_v27, %v1186_v26 }
 0x99f   :  { %v3287_v33 = vpop.eup %3286 }
 0x9a0   :  { %v808_v34 = vadd.f32 1.0, %v3287_v33  ;;  %v1183_v33 = vld [vmem:[%s1182_s19] sm:$0x1]  ;;  %s2576_s19 = sshll.u32 %s3569_s18, 4  ;;  %s2577_s19 = int_to_ptr.vmem [resolvable:$true] %s2576_s19 }
 0x9a1   :  { %s3498_s20 = scalar_lea.vmem %s2577_s19, 32  ;;  %p3503_p5 = scmp.lt.s32.totalorder %s2577_s19, %s2577_s19 }
 0x9a2   :  { %3288 = vrcp.f32 %v808_v34  ;;  %p3499_p4 = scmp.ne.s32.totalorder %s2577_s19, %s3498_s20  ;;  %p3504_p6 = scmp.lt.s32.totalorder %s3498_s20, %s3498_s20 }
 0x9a4   :  { %p3505_p7 = por %p3504_p6, %p3503_p5 }
 0x9a6   :  { %p3506_p8 = pnand %p3505_p7, %p3499_p4 }
 0x9ac   :  { %v3289_v35 = vpop.eup %3288 }
 0x9ad   :  { %v812_v38 = vmul.f32 %v3289_v35, %v646_v19 }
 0xa10   :  { %v815_v36 = vpop.permute.xlu1 %814 }
 0xa11   :  { %v817_v37 = vmul.f32 %v3289_v35, %v815_v36 }
 0xa13   :  { %819 = vrot.lane.b32.xlu0 %v817_v37, %s3567_s15 }
 0xa85   :  { %v820_v39 = vpop.permute.xlu0 %819 }
 0xa86   :  { %v822_v40 = vadd.f32 %v820_v39, %v812_v38 }
 0xa88   :  { %3290 = vtanh.f32 %v822_v40 }
 0xa92   :  { %v3291_v42 = vpop.eup %3290 }
 0xa93   :  { %825 = vrot.lane.b32.xlu1 %v3291_v42, %s3566_s23 }
 0xb05   :  { %v826_v43 = vpop.permute.xlu1 %825 }
 0xb06   :  { %v828_v44 = vmul.f32 %v3289_v35, %v826_v43 }
 0xb08   :  { %833 = vrot.lane.b32.xlu0 %v828_v44, %s3567_s15 }
 0xb7a   :  { %v834_v47 = vpop.permute.xlu0 %833 }
 0xb7b   :  { %2881 = vmatmul.mubr.msk.f32.vlgmr.msra.gmra.mrb[8].mxu0 %vm124_vm1, %v834_v47 }
 0xb7c   :  { %3143 = vmatpush3.bf16.msra.mxu0 %v3749_v5  ;;  %2902 = vmatprep.mubr.msk.f32.mxu0 %vm3564_vm0, %v3565_v1 }
 0xb7d   :  { %3144 = vmatprep.subr.bf16.mxu0 %v3563_v0 }
 0xb80   :  { %3146 = vmatpush3.bf16.msra.mxu0 %v3769_v12 }
 0xb81   :  { %3153 = vmatprep.subr.bf16.mxu0 %v3563_v0 }
 0xc4e   :  { %v903_v9 = vpop.f32.mrb[8].mxu0 }
 0xc4f   :  { %v977_v13 = vadd.f32 %v976_v45, %v903_v9  ;;  %v2882_v48 = vpop.f32.mrb[9].mxu0 }
 0xc51   :  { %v980_v49 = vadd.f32 %v977_v13, %v3797_v18 }
 0xc53   :  { %3292 = vtanh.f32 %v980_v49  ;;  %v2620_v51 = vmul.f32 -1.442695, %v980_v49 }
 0xc55   :  { %3294 = vpow2.f32 %v2620_v51 }
 0xc5d   :  { %v3293_v50 = vpop.eup %3292 }
 0xc5e   :  { %990 = vrot.lane.b32.xlu1 %v3293_v50, %s3566_s23 }
 0xc5f   :  { %v3295_v5 = vpop.eup %3294 }
 0xc60   :  { %v984_v52 = vadd.f32 1.0, %v3295_v5 }
 0xc62   :  { %3296 = vrcp.f32 %v984_v52  ;;  %v1366_v52 = vld [vmem:[%s4116_s10] sm:$0xff] }
 0xc6c   :  { %v3297_v53 = vpop.eup %3296 }
 0xc6d   :  { %v988_v12 = vmul.f32 %v3297_v53, %v822_v40 }
 0xcd0   :  { %v991_v54 = vpop.permute.xlu1 %990 }
 0xcd1   :  { %v993_v55 = vmul.f32 %v3297_v53, %v991_v54  ;;  %v1368_v54 = vld [vmem:[%s4116_s10 + $0x10] sm:$0xff] }
 0xcd3   :  { %995 = vrot.lane.b32.xlu0 %v993_v55, %s3567_s15 }
 0xd45   :  { %v996_v56 = vpop.permute.xlu0 %995 }
 0xd46   :  { %v998_v57 = vadd.f32 %v996_v56, %v988_v12  ;;  %v1369_v12 = vld [vmem:[%s4116_s10 + $0x18] sm:$0xff] }
 0xd47   :  { %v3938_v56 = vpack.c.bf16 %v1369_v12, %v1368_v54 }
 0xd48   :  { %3298 = vtanh.f32 %v998_v57 }
 0xd52   :  { %v3299_v59 = vpop.eup %3298 }
 0xd53   :  { %1001 = vrot.lane.b32.xlu1 %v3299_v59, %s3566_s23 }
 0xdc5   :  { %v1002_v60 = vpop.permute.xlu1 %1001 }
 0xdc6   :  { %v1004_v61 = vmul.f32 %v3297_v53, %v1002_v60  ;;  %v1367_v53 = vld [vmem:[%s4116_s10 + $0x8] sm:$0xff]  ;;  %s1461_s10 = scalar_lea.vmem [#allocation5], %s2629_s5 }
 0xdc7   :  { %v3932_v55 = vpack.c.bf16 %v1367_v53, %v1366_v52  ;;  %v2008_v52 = vld [vmem:[%s2007_s30] sm:$0x1] }
 0xdc8   :  { %1009 = vrot.lane.b32.xlu0 %v1004_v61, %s3567_s15  ;;  %v1462_v61 = vld [vmem:[%s1461_s10] sm:$0x1] }
 0xe3a   :  { %v1010_v2 = vpop.permute.xlu0 %1009 }
 0xe3b   :  { %2903 = vmatmul.mubr.msk.f32.vlgmr.msra.gmra.mrb[10].mxu0 %vm124_vm1, %v1010_v2 }
 0xe3c   :  { %2924 = vmatprep.mubr.msk.f32.mxu0 %vm3564_vm0, %v3565_v1  ;;  %3155 = vmatpush3.bf16.msra.mxu0 %v3895_v28 }
 0xe3d   :  { %3156 = vmatprep.subr.bf16.mxu0 %v3563_v0 }
 0xe40   :  { %3158 = vmatpush3.bf16.msra.mxu0 %v3902_v32 }
 0xe41   :  { %3165 = vmatprep.subr.bf16.mxu0 %v3563_v0 }
 0xf0e   :  { %v1079_v3 = vpop.f32.mrb[10].mxu0 }
 0xf0f   :  { %v1153_v4 = vadd.f32 %v1152_v62, %v1079_v3  ;;  %v2904_v6 = vpop.f32.mrb[11].mxu0 }
 0xf10   :  { %v1614_v6 = vld [vmem:[#allocation13] sm:$0x1] }
 0xf11   :  { %v1156_v7 = vadd.f32 %v1153_v4, %v3797_v18  ;;  %v1185_v18 = vld [vmem:[#allocation10 + $0x8] sm:$0xff] }
 0xf12   :  { %v3893_v24 = vpack.c.bf16 %v1185_v18, %v1184_v22 }
 0xf13   :  { %3300 = vtanh.f32 %v1156_v7  ;;  %v2624_v10 = vmul.f32 -1.442695, %v1156_v7 }
 0xf14   :  { %3161 = vmatpush3.bf16.msra.mxu1 %v3893_v24 }
 0xf15   :  { %3302 = vpow2.f32 %v2624_v10  ;;  %3162 = vmatprep.subr.bf16.mxu1 %v3563_v0 }
 0xf18   :  { %3164 = vmatpush3.bf16.msra.mxu1 %v3898_v31 }
 0xf19   :  { %3171 = vmatprep.subr.bf16.mxu1 %v3563_v0 }
 0xf1b   :  { %2936 = vmatmul.mubr.msk.f32.vlgmr.msra.gmra.mrb[12].mxu1 %vm124_vm1, %v1183_v33 }
 0xf1c   :  { %3173 = vmatpush3.bf16.msra.mxu1 %v3895_v28  ;;  %2957 = vmatprep.mubr.msk.f32.mxu1 %vm3564_vm0, %v3565_v1 }
 0xf1d   :  { %v3301_v8 = vpop.eup %3300  ;;  %3174 = vmatprep.subr.bf16.mxu1 %v3563_v0 }
 0xf1e   :  { %1166 = vrot.lane.b32.xlu1 %v3301_v8, %s3566_s23 }
 0xf1f   :  { %v3303_v11 = vpop.eup %3302 }
 0xf20   :  { %v1160_v14 = vadd.f32 1.0, %v3303_v11  ;;  %3176 = vmatpush3.bf16.msra.mxu1 %v3902_v32 }
 0xf21   :  { %3183 = vmatprep.subr.bf16.mxu1 %v3563_v0 }
 0xf22   :  { %3304 = vrcp.f32 %v1160_v14 }
 0xf2c   :  { %v3305_v15 = vpop.eup %3304 }
 0xf2d   :  { %v1164_v19 = vmul.f32 %v3305_v15, %v998_v57 }
 0xf90   :  { %v1167_v16 = vpop.permute.xlu1 %1166 }
 0xf91   :  { %v1169_v17 = vmul.f32 %v3305_v15, %v1167_v16 }
 0xf93   :  { %1171 = vrot.lane.b32.xlu0 %v1169_v17, %s3567_s15 }
 0xfee   :  { %v1336_v37 = vpop.f32.mrb[12].mxu1 }
 0xfef   :  { %v2937_v38 = vpop.f32.mrb[13].mxu1 }
0x1005   :  { %v1172_v20 = vpop.permute.xlu0 %1171 }
0x1006   :  { %v1174_v21 = vadd.f32 %v1172_v20, %v1164_v19 }
0x1008   :  { %3306 = vtanh.f32 %v1174_v21 }
0x1012   :  { %v3307_v34 = vpop.eup %3306 }
0x1013   :  { %1177 = vrot.lane.b32.xlu1 %v3307_v34, %s3566_s23 }
0x1085   :  { %v1178_v35 = vpop.permute.xlu1 %1177 }
0x1086   :  { %v1180_v36 = vmul.f32 %v3305_v15, %v1178_v35 }
0x1088   :  { %1193 = vrot.lane.b32.xlu0 %v1180_v36, %s3567_s15 }
0x10fa   :  { %v1194_v39 = vpop.permute.xlu0 %1193 }
0x10fb   :  { %2925 = vmatmul.mubr.msk.f32.vlgmr.msra.gmra.mrb[12].mxu0 %vm124_vm1, %v1194_v39 }
0x10fc   :  { %2946 = vmatprep.mubr.msk.f32.mxu0 %vm3564_vm0, %v3565_v1  ;;  %3167 = vmatpush3.bf16.msra.mxu0 %v3932_v55 }
0x10fd   :  { %3168 = vmatprep.subr.bf16.mxu0 %v3563_v0 }
0x1100   :  { %3170 = vmatpush3.bf16.msra.mxu0 %v3938_v56 }
0x1101   :  { %3177 = vmatprep.subr.bf16.mxu0 %v3563_v0 }
0x11ce   :  { %v1263_v40 = vpop.f32.mrb[12].mxu0 }
0x11cf   :  { %v1337_v42 = vadd.f32 %v1336_v37, %v1263_v40  ;;  %v2926_v43 = vpop.f32.mrb[13].mxu0  ;;  %v1887_v37 = vld [vmem:[#allocation13] sm:$0x1] }
0x11d1   :  { %v1341_v44 = vadd.f32 %v1340_v41, %v1337_v42 }
0x11d3   :  { %3308 = vtanh.f32 %v1341_v44  ;;  %v2627_v46 = vmul.f32 -1.442695, %v1341_v44 }
0x11d5   :  { %3310 = vpow2.f32 %v2627_v46 }
0x11dd   :  { %v3309_v45 = vpop.eup %3308 }
0x11de   :  { %1351 = vrot.lane.b32.xlu1 %v3309_v45, %s3566_s23 }
0x11df   :  { %v3311_v47 = vpop.eup %3310 }
0x11e0   :  { %v1345_v9 = vadd.f32 1.0, %v3311_v47 }
0x11e2   :  { %3312 = vrcp.f32 %v1345_v9 }
0x11ec   :  { %v3313_v13 = vpop.eup %3312 }
0x11ed   :  { %v1349_v50 = vmul.f32 %v3313_v13, %v1174_v21 }
0x1250   :  { %v1352_v48 = vpop.permute.xlu1 %1351 }
0x1251   :  { %v1354_v49 = vmul.f32 %v3313_v13, %v1352_v48 }
0x1253   :  { %1356 = vrot.lane.b32.xlu0 %v1354_v49, %s3567_s15 }
0x12c5   :  { %v1357_v51 = vpop.permute.xlu0 %1356 }
0x12c6   :  { %v1359_v5 = vadd.f32 %v1357_v51, %v1349_v50 }
0x12c8   :  { %3314 = vtanh.f32 %v1359_v5 }
0x12d2   :  { %v3315_v57 = vpop.eup %3314 }
0x12d3   :  { %1362 = vrot.lane.b32.xlu1 %v3315_v57, %s3566_s23 }
0x1345   :  { %v1363_v58 = vpop.permute.xlu1 %1362 }
0x1346   :  { %v1365_v59 = vmul.f32 %v3313_v13, %v1363_v58 }
0x1348   :  { %1372 = vrot.lane.b32.xlu0 %v1365_v59, %s3567_s15  ;;  %v2160_v59 = vld [vmem:[#allocation13] sm:$0x1] }
0x13ba   :  { %v1373_v60 = vpop.permute.xlu0 %1372 }
0x13bb   :  { %2947 = vmatmul.mubr.msk.f32.vlgmr.msra.gmra.mrb[14].mxu0 %vm124_vm1, %v1373_v60  ;;  %2958 = vmatmul.mubr.msk.f32.vlgmr.msra.gmra.mrb[14].mxu1 %vm124_vm1, %v1373_v60 }
0x13bc   :  { %3179 = vmatpush3.bf16.msra.mxu0 %v3893_v24  ;;  %2968 = vmatprep.mubr.msk.f32.mxu0 %vm3564_vm0, %v3565_v1 }
0x13bd   :  { %3180 = vmatprep.subr.bf16.mxu0 %v3563_v0  ;;  %3185 = vmatpush3.bf16.msra.mxu1 %v3932_v55 }
0x13be   :  { %3186 = vmatprep.subr.bf16.mxu1 %v3563_v0  ;;  %2979 = vmatprep.mubr.msk.f32.mxu1 %vm3564_vm0, %v3565_v1 }
0x13c0   :  { %3182 = vmatpush3.bf16.msra.mxu0 %v3898_v31 }
0x13c1   :  { %3189 = vmatprep.subr.bf16.mxu0 %v3563_v0  ;;  %3188 = vmatpush3.bf16.msra.mxu1 %v3938_v56 }
0x13c2   :  { %3195 = vmatprep.subr.bf16.mxu1 %v3563_v0 }
0x13c3   :  { %2969 = vmatmul.mubr.msk.f32.vlgmr.msra.gmra.mrb[16].mxu0 %vm124_vm1, %v1462_v61 }
0x13c4   :  { %3191 = vmatpush3.bf16.msra.mxu0 %v3895_v28  ;;  %2990 = vmatprep.mubr.msk.f32.mxu0 %vm3564_vm0, %v3565_v1 }
0x13c5   :  { %3192 = vmatprep.subr.bf16.mxu0 %v3563_v0 }
0x13c8   :  { %3194 = vmatpush3.bf16.msra.mxu0 %v3902_v32 }
0x13c9   :  { %3201 = vmatprep.subr.bf16.mxu0 %v3563_v0 }
0x148e   :  { %v3966_v62 = vpop.f32.mrb[14].mxu0  ;;  %v1537_v63 = vpop.f32.mrb[14].mxu1 }
0x148f   :  { %v2948_v2 = vpop.f32.mrb[15].mxu0  ;;  %v2959_v3 = vpop.f32.mrb[15].mxu1 }
0x1496   :  { %v1610_v4 = vpop.f32.mrb[16].mxu0 }
0x1497   :  { %v1611_v7 = vadd.f32 %v1610_v4, %v1537_v63  ;;  %v2970_v8 = vpop.f32.mrb[17].mxu0 }
0x1499   :  { %v1615_v10 = vadd.f32 %v1614_v6, %v1611_v7 }
0x149b   :  { %3316 = vtanh.f32 %v1615_v10  ;;  %v2632_v14 = vmul.f32 -1.442695, %v1615_v10 }
0x149d   :  { %3318 = vpow2.f32 %v2632_v14 }
0x14a5   :  { %v3317_v11 = vpop.eup %3316 }
0x14a6   :  { %1625 = vrot.lane.b32.xlu1 %v3317_v11, %s3566_s23 }
0x14a7   :  { %v3319_v15 = vpop.eup %3318 }
0x14a8   :  { %v1619_v16 = vadd.f32 1.0, %v3319_v15 }
0x14aa   :  { %3320 = vrcp.f32 %v1619_v16 }
0x14b4   :  { %v3321_v17 = vpop.eup %3320 }
0x14b5   :  { %v1623_v21 = vmul.f32 %v3321_v17, %v1359_v5 }
0x1518   :  { %v1626_v19 = vpop.permute.xlu1 %1625 }
0x1519   :  { %v1628_v20 = vmul.f32 %v3321_v17, %v1626_v19  ;;  %v2281_v19 = vld [vmem:[%s2280_s3] sm:$0x1] }
0x151b   :  { %1630 = vrot.lane.b32.xlu0 %v1628_v20, %s3567_s15 }
0x158d   :  { %v1631_v22 = vpop.permute.xlu0 %1630 }
0x158e   :  { %v1633_v18 = vadd.f32 %v1631_v22, %v1623_v21 }
0x1590   :  { %3322 = vtanh.f32 %v1633_v18 }
0x159a   :  { %v3323_v23 = vpop.eup %3322 }
0x159b   :  { %1636 = vrot.lane.b32.xlu1 %v3323_v23, %s3566_s23  ;;  %v2433_v23 = vld [vmem:[#allocation13] sm:$0x1] }
0x160d   :  { %v1637_v25 = vpop.permute.xlu1 %1636 }
0x160e   :  { %v1639_v26 = vmul.f32 %v3321_v17, %v1637_v25 }
0x1610   :  { %1646 = vrot.lane.b32.xlu0 %v1639_v26, %s3567_s15 }
0x1682   :  { %v1647_v27 = vpop.permute.xlu0 %1646 }
0x1683   :  { %2980 = vmatmul.mubr.msk.f32.vlgmr.msra.gmra.mrb[16].mxu1 %vm124_vm1, %v1647_v27  ;;  %2991 = vmatmul.mubr.msk.f32.vlgmr.msra.gmra.mrb[18].mxu0 %vm124_vm1, %v1647_v27 }
0x1684   :  { %3197 = vmatpush3.bf16.msra.mxu1 %v3893_v24  ;;  %3001 = vmatprep.mubr.msk.f32.mxu1 %vm3564_vm0, %v3565_v1 }
0x1685   :  { %3198 = vmatprep.subr.bf16.mxu1 %v3563_v0  ;;  %3203 = vmatpush3.bf16.msra.mxu0 %v3932_v55 }
0x1686   :  { %3204 = vmatprep.subr.bf16.mxu0 %v3563_v0  ;;  %3012 = vmatprep.mubr.msk.f32.mxu0 %vm3564_vm0, %v3565_v1 }
0x1688   :  { %3200 = vmatpush3.bf16.msra.mxu1 %v3898_v31 }
0x1689   :  { %3207 = vmatprep.subr.bf16.mxu1 %v3563_v0  ;;  %3206 = vmatpush3.bf16.msra.mxu0 %v3938_v56 }
0x168a   :  { %3213 = vmatprep.subr.bf16.mxu0 %v3563_v0 }
0x168b   :  { %3002 = vmatmul.mubr.msk.f32.vlgmr.msra.gmra.mrb[18].mxu1 %vm124_vm1, %v1735_v29 }
0x168c   :  { %3209 = vmatpush3.bf16.msra.mxu1 %v3895_v28  ;;  %3023 = vmatprep.mubr.msk.f32.mxu1 %vm3564_vm0, %v3565_v1 }
0x168d   :  { %3210 = vmatprep.subr.bf16.mxu1 %v3563_v0 }
0x1690   :  { %3212 = vmatpush3.bf16.msra.mxu1 %v3902_v32 }
0x1691   :  { %3219 = vmatprep.subr.bf16.mxu1 %v3563_v0 }
0x1756   :  { %v3993_v30 = vpop.f32.mrb[16].mxu1  ;;  %v1810_v33 = vpop.f32.mrb[18].mxu0 }
0x1757   :  { %v2981_v34 = vpop.f32.mrb[17].mxu1  ;;  %v2992_v35 = vpop.f32.mrb[19].mxu0 }
0x175e   :  { %v1883_v36 = vpop.f32.mrb[18].mxu1 }
0x175f   :  { %v1884_v38 = vadd.f32 %v1883_v36, %v1810_v33  ;;  %v3003_v39 = vpop.f32.mrb[19].mxu1 }
0x1761   :  { %v1888_v40 = vadd.f32 %v1887_v37, %v1884_v38  ;;  %v1370_v38 = vld [vmem:[%s4117_s11] sm:$0x1] }
0x1762   :  { %v1443_v39 = vadd.f32 %v3966_v62, %v1370_v38  ;;  %v1644_v62 = vld [vmem:[%s4117_s11] sm:$0x1] }
0x1763   :  { %3324 = vtanh.f32 %v1888_v40  ;;  %v2637_v42 = vmul.f32 -1.442695, %v1888_v40  ;;  %v2190_v40 = vld [vmem:[%s4117_s11] sm:$0x1] }
0x1765   :  { %3326 = vpow2.f32 %v2637_v42  ;;  %v1447_v42 = vsel %vm1446_vm2, %v1443_v39, -inf }
0x176d   :  { %v3325_v41 = vpop.eup %3324 }
0x176e   :  { %1898 = vrot.lane.b32.xlu1 %v3325_v41, %s3566_s23 }
0x176f   :  { %v3327_v43 = vpop.eup %3326 }
0x1770   :  { %v1892_v44 = vadd.f32 1.0, %v3327_v43 }
0x1772   :  { %3328 = vrcp.f32 %v1892_v44 }
0x177c   :  { %v3329_v45 = vpop.eup %3328 }
0x177d   :  { %v1896_v9 = vmul.f32 %v3329_v45, %v1633_v18 }
0x17e0   :  { %v1899_v46 = vpop.permute.xlu1 %1898 }
0x17e1   :  { %v1901_v47 = vmul.f32 %v3329_v45, %v1899_v46  ;;  %v1717_v46 = vadd.f32 %v3993_v30, %v1644_v62 }
0x17e3   :  { %1903 = vrot.lane.b32.xlu0 %v1901_v47, %s3567_s15  ;;  %v1917_v47 = vld [vmem:[%s4117_s11] sm:$0x1] }
0x1855   :  { %v1904_v13 = vpop.permute.xlu0 %1903 }
0x1856   :  { %v1906_v48 = vadd.f32 %v1904_v13, %v1896_v9  ;;  %v1720_v13 = vsel %vm1446_vm2, %v1717_v46, -inf }
0x1858   :  { %3330 = vtanh.f32 %v1906_v48 }
0x1862   :  { %v3331_v49 = vpop.eup %3330 }
0x1863   :  { %1909 = vrot.lane.b32.xlu1 %v3331_v49, %s3566_s23 }
0x18d5   :  { %v1910_v50 = vpop.permute.xlu1 %1909 }
0x18d6   :  { %v1912_v51 = vmul.f32 %v3329_v45, %v1910_v50 }
0x18d8   :  { %1919 = vrot.lane.b32.xlu0 %v1912_v51, %s3567_s15 }
0x194a   :  { %v1920_v5 = vpop.permute.xlu0 %1919 }
0x194b   :  { %3013 = vmatmul.mubr.msk.f32.vlgmr.msra.gmra.mrb[20].mxu0 %vm124_vm1, %v1920_v5  ;;  %3024 = vmatmul.mubr.msk.f32.vlgmr.msra.gmra.mrb[20].mxu1 %vm124_vm1, %v1920_v5 }
0x194c   :  { %3215 = vmatpush3.bf16.msra.mxu0 %v3893_v24  ;;  %3034 = vmatprep.mubr.msk.f32.mxu0 %vm3564_vm0, %v3565_v1 }
0x194d   :  { %3216 = vmatprep.subr.bf16.mxu0 %v3563_v0  ;;  %3221 = vmatpush3.bf16.msra.mxu1 %v3932_v55 }
0x194e   :  { %3222 = vmatprep.subr.bf16.mxu1 %v3563_v0  ;;  %3045 = vmatprep.mubr.msk.f32.mxu1 %vm3564_vm0, %v3565_v1 }
0x1950   :  { %3218 = vmatpush3.bf16.msra.mxu0 %v3898_v31 }
0x1951   :  { %3225 = vmatprep.subr.bf16.mxu0 %v3563_v0  ;;  %3224 = vmatpush3.bf16.msra.mxu1 %v3938_v56 }
0x1952   :  { %3231 = vmatprep.subr.bf16.mxu1 %v3563_v0 }
0x1953   :  { %3035 = vmatmul.mubr.msk.f32.vlgmr.msra.gmra.mrb[22].mxu0 %vm124_vm1, %v2008_v52 }
0x1954   :  { %3227 = vmatpush3.bf16.msra.mxu0 %v3895_v28  ;;  %3056 = vmatprep.mubr.msk.f32.mxu0 %vm3564_vm0, %v3565_v1 }
0x1955   :  { %3228 = vmatprep.subr.bf16.mxu0 %v3563_v0 }
0x1958   :  { %3230 = vmatpush3.bf16.msra.mxu0 %v3902_v32 }
0x1959   :  { %3237 = vmatprep.subr.bf16.mxu0 %v3563_v0 }
0x1a1e   :  { %v4020_v53 = vpop.f32.mrb[20].mxu0  ;;  %v2083_v54 = vpop.f32.mrb[20].mxu1 }
0x1a1f   :  { %v3014_v12 = vpop.f32.mrb[21].mxu0  ;;  %v3025_v57 = vpop.f32.mrb[21].mxu1  ;;  %v1990_v9 = vadd.f32 %v4020_v53, %v1917_v47 }
0x1a26   :  { %v2156_v58 = vpop.f32.mrb[22].mxu0 }
0x1a27   :  { %v2157_v60 = vadd.f32 %v2156_v58, %v2083_v54  ;;  %v3036_v61 = vpop.f32.mrb[23].mxu0 }
0x1a29   :  { %v2161_v63 = vadd.f32 %v2160_v59, %v2157_v60 }
0x1a2b   :  { %3332 = vtanh.f32 %v2161_v63  ;;  %v2642_v2 = vmul.f32 -1.442695, %v2161_v63 }
0x1a2d   :  { %3334 = vpow2.f32 %v2642_v2 }
0x1a35   :  { %v3333_v28 = vpop.eup %3332 }
0x1a36   :  { %2171 = vrot.lane.b32.xlu1 %v3333_v28, %s3566_s23 }
0x1a37   :  { %v3335_v3 = vpop.eup %3334 }
0x1a38   :  { %v2165_v32 = vadd.f32 1.0, %v3335_v3 }
0x1a3a   :  { %3336 = vrcp.f32 %v2165_v32 }
0x1a44   :  { %v3337_v4 = vpop.eup %3336 }
0x1a45   :  { %v2169_v8 = vmul.f32 %v3337_v4, %v1906_v48  ;;  %v1993_v48 = vsel %vm1446_vm2, %v1990_v9, -inf }
0x1aa8   :  { %v2172_v6 = vpop.permute.xlu1 %2171 }
0x1aa9   :  { %v2174_v7 = vmul.f32 %v3337_v4, %v2172_v6 }
0x1aab   :  { %2176 = vrot.lane.b32.xlu0 %v2174_v7, %s3567_s15  ;;  %v2463_v7 = vld [vmem:[%s4117_s11] sm:$0x1]  ;;  %s3568_s11 = smov 96  }
0x1b1d   :  { %v2177_v10 = vpop.permute.xlu0 %2176 }
0x1b1e   :  { %v2179_v11 = vadd.f32 %v2177_v10, %v2169_v8 }
0x1b20   :  { %3338 = vtanh.f32 %v2179_v11 }
0x1b2a   :  { %v3339_v14 = vpop.eup %3338 }
0x1b2b   :  { %2182 = vrot.lane.b32.xlu1 %v3339_v14, %s3566_s23 }
0x1b9d   :  { %v2183_v15 = vpop.permute.xlu1 %2182 }
0x1b9e   :  { %v2185_v16 = vmul.f32 %v3337_v4, %v2183_v15 }
0x1ba0   :  { %2192 = vrot.lane.b32.xlu0 %v2185_v16, %s3567_s15 }
0x1c12   :  { %v2193_v17 = vpop.permute.xlu0 %2192 }
0x1c13   :  { %3046 = vmatmul.mubr.msk.f32.vlgmr.msra.gmra.mrb[22].mxu1 %vm124_vm1, %v2193_v17  ;;  %3057 = vmatmul.mubr.msk.f32.vlgmr.msra.gmra.mrb[24].mxu0 %vm124_vm1, %v2193_v17 }
0x1c14   :  { %3233 = vmatpush3.bf16.msra.mxu1 %v3893_v24  ;;  %3067 = vmatprep.mubr.msk.f32.mxu1 %vm3564_vm0, %v3565_v1 }
0x1c15   :  { %3234 = vmatprep.subr.bf16.mxu1 %v3563_v0  ;;  %3239 = vmatpush3.bf16.msra.mxu0 %v3932_v55 }
0x1c16   :  { %3240 = vmatprep.subr.bf16.mxu0 %v3563_v0  ;;  %3078 = vmatprep.mubr.msk.f32.mxu0 %vm3564_vm0, %v3565_v1 }
0x1c18   :  { %3236 = vmatpush3.bf16.msra.mxu1 %v3898_v31 }
0x1c19   :  { %3242 = vmatpush3.bf16.msra.mxu0 %v3938_v56 }
0x1c1b   :  { %3068 = vmatmul.mubr.msk.f32.vlgmr.msra.gmra.mrb[24].mxu1 %vm124_vm1, %v2281_v19 }
0x1ce6   :  { %v2262_v24 = vpop.f32.mrb[22].mxu1  ;;  %v2356_v20 = vpop.f32.mrb[24].mxu0 }
0x1ce7   :  { %v3047_v21 = vpop.f32.mrb[23].mxu1  ;;  %v3058_v22 = vpop.f32.mrb[25].mxu0  ;;  %v2263_v41 = vadd.f32 %v2262_v24, %v2190_v40 }
0x1ce9   :  { %v2266_v43 = vsel %vm1446_vm2, %v2263_v41, -inf }
0x1cee   :  { %v2429_v18 = vpop.f32.mrb[24].mxu1 }
0x1cef   :  { %v2430_v55 = vadd.f32 %v2429_v18, %v2356_v20  ;;  %v3069_v25 = vpop.f32.mrb[25].mxu1 }
0x1cf1   :  { %v2434_v0 = vadd.f32 %v2433_v23, %v2430_v55 }
0x1cf3   :  { %3340 = vtanh.f32 %v2434_v0  ;;  %v2647_v1 = vmul.f32 -1.442695, %v2434_v0 }
0x1cf5   :  { %3342 = vpow2.f32 %v2647_v1 }
0x1cfd   :  { %v3341_v26 = vpop.eup %3340 }
0x1cfe   :  { %2444 = vrot.lane.b32.xlu1 %v3341_v26, %s3566_s23 }
0x1cff   :  { %v3343_v31 = vpop.eup %3342 }
0x1d00   :  { %v2438_v27 = vadd.f32 1.0, %v3343_v31 }
0x1d02   :  { %3344 = vrcp.f32 %v2438_v27 }
0x1d0c   :  { %v3345_v56 = vpop.eup %3344 }
0x1d0d   :  { %v2442_v34 = vmul.f32 %v3345_v56, %v2179_v11 }
0x1d70   :  { %v2445_v29 = vpop.permute.xlu1 %2444 }
0x1d71   :  { %v2447_v33 = vmul.f32 %v3345_v56, %v2445_v29 }
0x1d73   :  { %2449 = vrot.lane.b32.xlu0 %v2447_v33, %s3567_s15 }
0x1de5   :  { %v2450_v35 = vpop.permute.xlu0 %2449 }
0x1de6   :  { %v4041_v36 = vadd.f32 %v2450_v35, %v2442_v34 }
0x1de8   :  { %3346 = vtanh.f32 %v4041_v36 }
0x1df2   :  { %v3347_v37 = vpop.eup %3346 }
0x1df3   :  { %2455 = vrot.lane.b32.xlu1 %v3347_v37, %s3566_s23 }
0x1e17   :  { %1448 = vmax.xlane.f32.xlu1 %v1447_v42 }
0x1e1b   :  { %2267 = vmax.xlane.f32.xlu1 %v2266_v43 }
0x1e65   :  { %v2456_v44 = vpop.permute.xlu1 %2455 }
0x1e66   :  { %v2458_v45 = vmul.f32 %v3345_v56, %v2456_v44 }
0x1e68   :  { %2465 = vrot.lane.b32.xlu0 %v2458_v45, %s3567_s15 }
0x1e87   :  { %1721 = vmax.xlane.f32.xlu0 %v1720_v13 }
0x1e8b   :  { %1994 = vmax.xlane.f32.xlu0 %v1993_v48 }
0x1ea4   :  { %v1449_v49 = vpop.xlane.xlu1 %1448 }
0x1ea5   :  { %v1450_v50 = vsub.f32 %v1443_v39, %v1449_v49 }
0x1ea7   :  { %v1451_v51 = vmul.f32 1.442695, %v1450_v50 }
0x1ea8   :  { %v2268_v60 = vpop.xlane.xlu1 %2267 }
0x1ea9   :  { %3348 = vpow2.f32 %v1451_v51  ;;  %v2269_v32 = vsub.f32 %v2263_v41, %v2268_v60 }
0x1eab   :  { %v2270_v6 = vmul.f32 1.442695, %v2269_v32 }
0x1eb3   :  { %v3349_v5 = vpop.eup %3348 }
0x1eb4   :  { %v1453_v52 = vsel %vm1446_vm2, %v3349_v5, 0.0 }
0x1eb5   :  { %1454 = vadd.xlane.f32.xlu1 %v1453_v52 }
0x1eda   :  { %v2466_v30 = vpop.permute.xlu0 %2465 }
0x1edb   :  { %2554 = vst.msk [vmem:[#allocation15] sm:$0x1] %vm2553_vm3, %v2466_v30  ;;  %3079 = vmatmul.mubr.msk.f32.vlgmr.msra.gmra.mrb[26].mxu0 %vm124_vm1, %v2466_v30 }
0x1f14   :  { %v1722_v53 = vpop.xlane.xlu0 %1721 }
0x1f15   :  { %v1723_v3 = vsub.f32 %v1717_v46, %v1722_v53 }
0x1f17   :  { %v1724_v4 = vmul.f32 1.442695, %v1723_v3 }
0x1f18   :  { %v1995_v54 = vpop.xlane.xlu0 %1994 }
0x1f19   :  { %v1996_v12 = vsub.f32 %v1990_v9, %v1995_v54 }
0x1f1b   :  { %v1997_v57 = vmul.f32 1.442695, %v1996_v12 }
0x1f1d   :  { %3350 = vpow2.f32 %v1997_v57 }
0x1f27   :  { %v3351_v58 = vpop.eup %3350 }
0x1f28   :  { %v1999_v59 = vsel %vm1446_vm2, %v3351_v58, 0.0 }
0x1f29   :  { %2000 = vadd.xlane.f32.xlu1 %v1999_v59 }
0x1f42   :  { %v1455_v61 = vpop.xlane.xlu1 %1454 }
0x1f43   :  { %3352 = vlog2.f32 %v1455_v61 }
0x1f44   :  { %3354 = vpow2.f32 %v1724_v4 }
0x1f45   :  { %3356 = vpow2.f32 %v2270_v6 }
0x1f4d   :  { %v3353_v63 = vpop.eup %3352 }
0x1f4e   :  { %v1457_v28 = vmul.f32 0.6931472, %v3353_v63  ;;  %v3355_v15 = vpop.eup %3354 }
0x1f4f   :  { %v1726_v16 = vsel %vm1446_vm2, %v3355_v15, 0.0  ;;  %v3357_v17 = vpop.eup %3356 }
0x1f50   :  { %v1458_v2 = vsub.f32 %v1450_v50, %v1457_v28  ;;  %v2272_v24 = vsel %vm1446_vm2, %v3357_v17, 0.0 }
0x1f52   :  { %1459 = vst.msk [vmem:[#allocation14] sm:$0x1] %vm1446_vm2, %v1458_v2 }
0x1fae   :  { %v2535_v8 = vpop.f32.mrb[26].mxu0 }
0x1faf   :  { %v2536_v10 = vadd.f32 %v2535_v8, %v2463_v7  ;;  %v3080_v11 = vpop.f32.mrb[27].mxu0 }
0x1fb1   :  { %v2539_v14 = vsel %vm1446_vm2, %v2536_v10, -inf }
0x1fb2   :  { %2540 = vmax.xlane.f32.xlu0 %v2539_v14 }
0x1fb6   :  { %v2001_v19 = vpop.xlane.xlu1 %2000  ;;  %1727 = vadd.xlane.f32.xlu0 %v1726_v16 }
0x1fb7   :  { %3358 = vlog2.f32 %v2001_v19 }
0x1fba   :  { %2273 = vadd.xlane.f32.xlu0 %v2272_v24 }
0x1fc1   :  { %v3359_v20 = vpop.eup %3358 }
0x1fc2   :  { %v2003_v21 = vmul.f32 0.6931472, %v3359_v20 }
0x1fc4   :  { %v2004_v22 = vsub.f32 %v1996_v12, %v2003_v21 }
0x1fc6   :  { %2005 = vst.msk [vmem:[#allocation14 + $0x2] sm:$0x1] %vm1446_vm2, %v2004_v22 }
0x1fd0   :  { %2556 = vrot.lane.b32.xlu0 %v4041_v36, %s3568_s11 }
0x203f   :  { %v2541_v18 = vpop.xlane.xlu0 %2540 }
0x2040   :  { %v2542_v23 = vsub.f32 %v2536_v10, %v2541_v18 }
0x2042   :  { %v2543_v55 = vmul.f32 1.442695, %v2542_v23 }
0x2043   :  { %v1728_v25 = vpop.xlane.xlu0 %1727 }
0x2044   :  { %3360 = vpow2.f32 %v2543_v55 }
0x2045   :  { %3362 = vlog2.f32 %v1728_v25 }
0x2047   :  { %v2274_v0 = vpop.xlane.xlu0 %2273 }
0x2048   :  { %3364 = vlog2.f32 %v2274_v0 }
0x204b   :  { %v2557_v26 = vpop.permute.xlu0 %2556 }
0x204c   :  { %2559 = vst.msk [vmem:[#allocation15 + $0x1] sm:$0x1] %vm2553_vm3, %v2557_v26 }
0x204e   :  { %v3361_v1 = vpop.eup %3360 }
0x204f   :  { %v3363_v31 = vpop.eup %3362  ;;  %v2545_v27 = vsel %vm1446_vm2, %v3361_v1, 0.0 }
0x2050   :  { %v1730_v56 = vmul.f32 0.6931472, %v3363_v31  ;;  %2546 = vadd.xlane.f32.xlu1 %v2545_v27 }
0x2052   :  { %v3365_v29 = vpop.eup %3364  ;;  %v1731_v33 = vsub.f32 %v1723_v3, %v1730_v56 }
0x2053   :  { %v2276_v34 = vmul.f32 0.6931472, %v3365_v29 }
0x2054   :  { %1732 = vst.msk [vmem:[#allocation14 + $0x1] sm:$0x1] %vm1446_vm2, %v1731_v33 }
0x2055   :  { %v2277_v35 = vsub.f32 %v2269_v32, %v2276_v34 }
0x2057   :  { %2278 = vst.msk [vmem:[#allocation14 + $0x3] sm:$0x1] %vm1446_vm2, %v2277_v35 }
0x2058   :  { %3509 = shalt.err (!%p3506_p8)
}
0x2059   :  { %s3510_s21 = scalar_lea.hbm %s4119_s13, 32 }
0x205a   :  { %p3511_p9 = scmp.ne.s32.totalorder %s4119_s13, %s3510_s21  ;;  %p3514_p10 = scmp.lt.u32.totalorder %s3510_s21, %s4119_s13 }
0x205c   :  { %p3516_p11 = pnand %p3514_p10, %p3511_p9 }
0x205e   :  { %3519 = shalt.err (!%p3516_p11)
}
0x205f   :  { %2579 = dma.vmem_to_hbm [thread:$0]  %s2577_s19, 32, %s4119_s13, [#allocation16]  }
0x2060   :  { %s3570_s8 = smov [#allocation14]  }
0x2061   :  { %s2566_s4 = sshll.u32 %s3570_s8, 4  ;;  %s2567_s4 = int_to_ptr.vmem [resolvable:$true] %s2566_s4 }
0x2062   :  { %s3520_s0 = scalar_lea.vmem %s2567_s4, 128  ;;  %p3525_p13 = scmp.lt.s32.totalorder %s2567_s4, %s2567_s4 }
0x2063   :  { %p3521_p12 = scmp.ne.s32.totalorder %s2567_s4, %s3520_s0  ;;  %p3526_p0 = scmp.lt.s32.totalorder %s3520_s0, %s3520_s0 }
0x2065   :  { %p3527_p1 = por %p3526_p0, %p3525_p13 }
0x2067   :  { %p3528_p2 = pnand %p3527_p1, %p3521_p12 }
0x20dd   :  { %v2547_v36 = vpop.xlane.xlu1 %2546 }
0x20de   :  { %3366 = vlog2.f32 %v2547_v36 }
0x20e8   :  { %v3367_v37 = vpop.eup %3366 }
0x20e9   :  { %v2549_v38 = vmul.f32 0.6931472, %v3367_v37 }
0x20eb   :  { %v2550_v39 = vsub.f32 %v2542_v23, %v2549_v38 }
0x20ed   :  { %2551 = vst.msk [vmem:[#allocation14 + $0x4] sm:$0x1] %vm1446_vm2, %v2550_v39 }
0x20ee   :  { %3531 = shalt.err (!%p3528_p2)
}
0x20ef   :  { %s3532_s13 = scalar_lea.hbm %s4118_s12, 128 }
0x20f0   :  { %p3533_p3 = scmp.ne.s32.totalorder %s4118_s12, %s3532_s13  ;;  %p3536_p4 = scmp.lt.u32.totalorder %s3532_s13, %s4118_s12 }
0x20f2   :  { %p3538_p5 = pnand %p3536_p4, %p3533_p3 }
0x20f4   :  { %3541 = shalt.err (!%p3538_p5)
}
0x20f5   :  { %2569 = dma.vmem_to_hbm [thread:$0]  %s2567_s4, 128, %s4118_s12, [#allocation7]  }
0x20f6   :  { %3550 = dma.done.wait [#allocation7], 128  }
0x20f7   :  { %3551 = vsyncadd [#allocation7], 4294967168 }
0x20f8   :  { %3552 = dma.done.wait [#allocation16], 32  }
0x20f9   :  { %3553 = vsyncadd [#allocation16], 4294967264 }
0x20fa   :  { %2586 = vsyncpa [#allocation6], 1 }
0x20fb   :  { %2587 = vsyncpa [#allocation9], 1 }
0x20fc   :  { %2588 = vsyncpa [#allocation12], 1 }
0x20fd   :  { %2589 = vsyncpa [#allocation7], 1 }
0x20fe   :  { %2590 = vsyncpa [#allocation16], 1 }

</bundles_post_ra>
